<compile_context>
chip_gen: v5e
topology: v5e:2x2
jax: 0.10.0
libtpu: 0.0.40
codegen_flags: <defaults>
</compile_context>

<pallas_src>
import jax
import jax.numpy as jnp
from jax import lax
from jax.experimental import pallas as pl
from jax.experimental.pallas import tpu as pltpu

_LANE = 128   # lane width
_SUB = 8      # sublane width (f32)


def _ceil_to(n, m):
    return -(-n // m) * m


# ----------------------------------------------------------------------------
# Kernel 1: bias-free linear projection  (src_dimmap / schema_dimmap)
#           flattened, padded, bf16 operands, f32 accumulate, lane-dense output
# ----------------------------------------------------------------------------
def _linear_kernel(x_ref, w_ref, o_ref):
    o_ref[...] = jnp.dot(x_ref[...], w_ref[...],
                         preferred_element_type=jnp.float32)


def linear_nobias(x, w):
    """(..., Din) @ (Din, Dout) with no bias; Pallas tiled MXU matmul."""
    Din = x.shape[-1]
    Dout = w.shape[1]
    lead = x.shape[:-1]
    x2 = x.reshape(-1, Din)
    M = x2.shape[0]

    Dp = _ceil_to(Din, _LANE)
    Op = _ceil_to(Dout, _LANE)
    Mp = _ceil_to(M, _SUB)
    tile_m = min(Mp, 256)
    Mp = _ceil_to(Mp, tile_m)

    x2 = jnp.pad(x2, ((0, Mp - M), (0, Dp - Din))).astype(jnp.bfloat16)
    wp = jnp.pad(w, ((0, Dp - Din), (0, Op - Dout))).astype(jnp.bfloat16)

    out = pl.pallas_call(
        _linear_kernel,
        out_shape=jax.ShapeDtypeStruct((Mp, Op), jnp.float32),
        grid=(Mp // tile_m,),
        in_specs=[
            pl.BlockSpec((tile_m, Dp), lambda i: (i, 0)),
            pl.BlockSpec((Dp, Op), lambda i: (0, 0)),
        ],
        out_specs=pl.BlockSpec((tile_m, Op), lambda i: (i, 0)),
        compiler_params=pltpu.CompilerParams(dimension_semantics=("parallel",)),
    )(x2, wp)
    return out[:M, :Dout].reshape(*lead, Dout)


# ----------------------------------------------------------------------------
# Kernel 2: fused bidirectional LSTM recurrence (schema_lstm)
#           grid=(2,) over directions; x@Wih hoisted out of the serial loop.
# Outputs: masked sum of hidden states ('avg') and final valid hidden ('last').
# ----------------------------------------------------------------------------
def _bilstm_kernel(x_ref, m_ref, wih_ref, whh_ref, b_ref,
                   sum_ref, last_ref, xw_ref):
    T, N, _ = m_ref.shape            # (T, Np, 1)
    Hp = last_ref.shape[2]           # padded per-direction hidden (128-multiple)

    # Hoisted input projection: ONE MXU matmul covering every timestep.
    xw_ref[...] = jnp.dot(x_ref[0], wih_ref[0],
                          preferred_element_type=jnp.float32)

    whh = whh_ref[0]                 # (Hp, 4Hp) bf16
    b = b_ref[0]                     # (1, 4Hp)  f32  (= b_ih + b_hh)

    def step(t, carry):
        h, c, s = carry
        m_t = m_ref[t]               # (N, 1) float mask
        row = pl.multiple_of(t * N, _SUB)
        gates = (xw_ref[pl.ds(row, N), :]
                 + jnp.dot(h.astype(jnp.bfloat16), whh,
                           preferred_element_type=jnp.float32)
                 + b)
        i = jax.nn.sigmoid(gates[:, 0 * Hp:1 * Hp])
        f = jax.nn.sigmoid(gates[:, 1 * Hp:2 * Hp])
        g = jnp.tanh(gates[:, 2 * Hp:3 * Hp])
        o = jax.nn.sigmoid(gates[:, 3 * Hp:4 * Hp])
        c_new = f * c + i * g
        h_new = o * jnp.tanh(c_new)
        h = m_t * h_new + (1.0 - m_t) * h
        c = m_t * c_new + (1.0 - m_t) * c
        s = s + m_t * h_new
        return (h, c, s)

    z = jnp.zeros((N, Hp), jnp.float32)
    h, _, s = lax.fori_loop(0, T, step, (z, z, z), unroll=True)
    last_ref[0] = h
    sum_ref[0] = s


def bilstm_avg_last(wemb_header, hdr_lens, wih_f, whh_f, b_f,
                    wih_b, whh_b, b_b, H):
    """Fused bi-LSTM over padded header tokens; returns (masked-sum, last) of
    hidden states, each concatenated over directions -> (N, 2H)."""
    N, T, Din = wemb_header.shape
    Hp = _ceil_to(H, _LANE)
    Dp = _ceil_to(Din, _LANE)
    Np = _ceil_to(N, _SUB)

    # forward / reversed sequences. Valid tokens of the reversed sequence are
    # packed at the front, so the forward-order mask stays valid for both
    # directions (do not change the reversal scheme without updating masking).
    t_idx = jnp.arange(T)[None, :]
    lens = hdr_lens[:, None]
    mask_nt = (t_idx < lens).astype(jnp.float32)                  # (N, T)
    rev_idx = jnp.where(t_idx < lens, lens - 1 - t_idx, t_idx)
    x_fwd = wemb_header
    x_bwd = jnp.take_along_axis(wemb_header, rev_idx[:, :, None], axis=1)

    x = jnp.stack([x_fwd, x_bwd], axis=0)                         # (2, N, T, D)
    x = jnp.transpose(x, (0, 2, 1, 3))                            # (2, T, N, D)
    x = jnp.pad(x, ((0, 0), (0, 0), (0, Np - N), (0, Dp - Din)))
    x = x.reshape(2, T * Np, Dp).astype(jnp.bfloat16)             # time rows flattened

    mask = jnp.transpose(mask_nt)[:, :, None]                     # (T, N, 1)
    mask = jnp.pad(mask, ((0, 0), (0, Np - N), (0, 0)))           # (T, Np, 1)

    def pad_gates(w, rows_pad):
        # place each gate's H columns at a lane-aligned offset k*Hp
        out = jnp.zeros((rows_pad, 4 * Hp), jnp.float32)
        r = w.shape[0]
        for k in range(4):
            out = out.at[:r, k * Hp:k * Hp + H].set(w[:, k * H:(k + 1) * H])
        return out

    wih = jnp.stack([pad_gates(wih_f, Dp),
                     pad_gates(wih_b, Dp)]).astype(jnp.bfloat16)  # (2, Dp, 4Hp)
    whh = jnp.stack([pad_gates(whh_f, Hp),
                     pad_gates(whh_b, Hp)]).astype(jnp.bfloat16)  # (2, Hp, 4Hp)
    bias = jnp.stack([pad_gates(b_f, 1), pad_gates(b_b, 1)])      # (2, 1, 4Hp) f32

    sum_o, last_o = pl.pallas_call(
        _bilstm_kernel,
        out_shape=(jax.ShapeDtypeStruct((2, Np, Hp), jnp.float32),
                   jax.ShapeDtypeStruct((2, Np, Hp), jnp.float32)),
        grid=(2,),
        in_specs=[
            pl.BlockSpec((1, T * Np, Dp), lambda d: (d, 0, 0)),
            pl.BlockSpec((T, Np, 1), lambda d: (0, 0, 0)),
            pl.BlockSpec((1, Dp, 4 * Hp), lambda d: (d, 0, 0)),
            pl.BlockSpec((1, Hp, 4 * Hp), lambda d: (d, 0, 0)),
            pl.BlockSpec((1, 1, 4 * Hp), lambda d: (d, 0, 0)),
        ],
        out_specs=(pl.BlockSpec((1, Np, Hp), lambda d: (d, 0, 0)),
                   pl.BlockSpec((1, Np, Hp), lambda d: (d, 0, 0))),
        scratch_shapes=[pltpu.VMEM((T * Np, 4 * Hp), jnp.float32)],
        compiler_params=pltpu.CompilerParams(dimension_semantics=("parallel",)),
    )(x, mask, wih, whh, bias)

    sum_cat = jnp.concatenate([sum_o[0, :N, :H], sum_o[1, :N, :H]], axis=-1)
    last_cat = jnp.concatenate([last_o[0, :N, :H], last_o[1, :N, :H]], axis=-1)
    return sum_cat, last_cat


# ----------------------------------------------------------------------------
# Kernel 3: col_encodings + index_select(tab_encodings, col_tids)
#           vectorized one-hot gather on the MXU, lane-dense store
# ----------------------------------------------------------------------------
def _gather_add_kernel(col_ref, tab_ref, oh_ref, o_ref):
    # col_ref: (1, Cp, Hp), tab_ref: (1, Tp, Hp), oh_ref: (1, Cp, Tp)
    o_ref[0] = col_ref[0] + jnp.dot(oh_ref[0], tab_ref[0],
                                    preferred_element_type=jnp.float32)


def col_plus_tab(col_enc, tab_enc, col_tids):
    B, C, H = col_enc.shape
    Tt = tab_enc.shape[1]
    Hp = _ceil_to(H, _LANE)
    Cp = _ceil_to(C, _SUB)
    Tp = _ceil_to(Tt, _SUB)

    col_p = jnp.pad(col_enc, ((0, 0), (0, Cp - C), (0, Hp - H)))
    tab_p = jnp.pad(tab_enc, ((0, 0), (0, Tp - Tt), (0, Hp - H)))
    tids_p = jnp.pad(col_tids, ((0, 0), (0, Cp - C)))
    # exact gather: one-hot (f32) x f32 table rows
    onehot = (tids_p[:, :, None] ==
              jnp.arange(Tp, dtype=jnp.int32)[None, None, :]).astype(jnp.float32)

    out = pl.pallas_call(
        _gather_add_kernel,
        out_shape=jax.ShapeDtypeStruct((B, Cp, Hp), jnp.float32),
        grid=(B,),
        in_specs=[
            pl.BlockSpec((1, Cp, Hp), lambda b: (b, 0, 0)),
            pl.BlockSpec((1, Tp, Hp), lambda b: (b, 0, 0)),
            pl.BlockSpec((1, Cp, Tp), lambda b: (b, 0, 0)),
        ],
        out_specs=pl.BlockSpec((1, Cp, Hp), lambda b: (b, 0, 0)),
        compiler_params=pltpu.CompilerParams(dimension_semantics=("parallel",)),
    )(col_p, tab_p, onehot)
    return out[:, :C, :H]


# ----------------------------------------------------------------------------
# Wrapper reproducing RatBERTEncoder.score compute graph (eval mode)
# ----------------------------------------------------------------------------
def rat_bert_forward(params, wemb_question, wemb_header, hdr_lens,
                     q_lens, tab_nums, col_nums, col_tids, hidden):
    B = wemb_question.shape[0]
    H_lstm = hidden // 2

    # --- schema_lstm (fused bidirectional Pallas kernel) + 'avg+last' agg -----
    sum_cat, last_cat = bilstm_avg_last(
        wemb_header, hdr_lens,
        params["wih_f"], params["whh_f"], params["b_f"],
        params["wih_b"], params["whh_b"], params["b_b"], H_lstm)
    lens_f = jnp.maximum(hdr_lens.astype(jnp.float32), 1.0)[:, None]
    avg = sum_cat / lens_f
    emb = avg + last_cat   # col_tbl_feat_agg='avg+last'
    # TODO(synk): exact aggregation used by encode_header is not given in the source.

    # scatter flat per-header embeddings into padded per-example layout
    # TODO(synk): for large B this should become one scalar-prefetch scatter kernel.
    max_hdr = max(tab_nums[i] + col_nums[i] for i in range(B))
    tab_col = jnp.zeros((B, max_hdr, hidden), jnp.float32)
    off = 0
    for i in range(B):
        n = tab_nums[i] + col_nums[i]
        tab_col = tab_col.at[i, :n].set(emb[off:off + n])
        off += n

    # --- dimension maps (flattened, padded, bf16 Pallas matmuls) ---------------
    src_enc = linear_nobias(wemb_question, params["w_src"])       # src_dimmap
    tab_col_enc = linear_nobias(tab_col, params["w_sch"])         # schema_dimmap

    # --- per-example concat [question ; columns ; tables] ----------------------
    enc_lens = [q_lens[i] + col_nums[i] + tab_nums[i] for i in range(B)]
    max_enc = max(enc_lens)
    cat = jnp.zeros((B, max_enc, hidden), jnp.float32)
    for i in range(B):
        q = src_enc[i, :q_lens[i]]
        cols = tab_col_enc[i, tab_nums[i]:tab_nums[i] + col_nums[i]]
        tabs = tab_col_enc[i, :tab_nums[i]]
        seq = jnp.concatenate([q, cols, tabs], axis=0)
        cat = cat.at[i, :enc_lens[i]].set(seq)

    # --- RelationalTransformer: identity (TODO(synk): external module) ---------
    enc_padded = cat
    max_cols = max(col_nums)
    max_tabs = max(tab_nums)
    c_enc = jnp.zeros((B, max_cols, hidden), jnp.float32)
    t_enc = jnp.zeros((B, max_tabs, hidden), jnp.float32)
    for i in range(B):
        c_enc = c_enc.at[i, :col_nums[i]].set(
            cat[i, q_lens[i]:q_lens[i] + col_nums[i]])
        t_enc = t_enc.at[i, :tab_nums[i]].set(
            cat[i, q_lens[i] + col_nums[i]:enc_lens[i]])

    # --- col_encodings = col_enc + gather(tab_enc, col_tids) (Pallas kernel) ---
    col_encodings = col_plus_tab(c_enc, t_enc, col_tids)

    return enc_padded, col_encodings, enc_lens, col_nums


# ----------------------------------------------------------------------------
if __name__ == "__main__":
    hidden = 32           # model hidden_size
    bert_h = 32           # synthetic "BERT" hidden size (bert_out_n = bert_out_h = 1)
    H_lstm = hidden // 2  # per-direction LSTM hidden
    B = 2
    S_src = 6
    q_lens = [5, 4]
    tab_nums = [2, 1]
    col_nums = [3, 3]
    T_hdr = 4
    # headers per example ordered [tables..., columns...]
    hdr_lens_list = [2, 3, 1, 2, 4,   2, 1, 3, 2]
    N_hdr = len(hdr_lens_list)

    key = jax.random.PRNGKey(0)
    ks = jax.random.split(key, 12)

    def init(k, shape, scale=0.05):
        return (scale * jax.random.normal(k, shape)).astype(jnp.float32)

    params = {
        "w_src": init(ks[0], (bert_h, hidden)),           # src_dimmap (no bias)
        "w_sch": init(ks[1], (hidden, hidden)),           # schema_dimmap (no bias)
        "wih_f": init(ks[2], (bert_h, 4 * H_lstm)),       # schema_lstm fwd
        "whh_f": init(ks[3], (H_lstm, 4 * H_lstm)),
        "b_f":   init(ks[4], (1, 4 * H_lstm)),            # b_ih + b_hh combined
        "wih_b": init(ks[5], (bert_h, 4 * H_lstm)),       # schema_lstm bwd
        "whh_b": init(ks[6], (H_lstm, 4 * H_lstm)),
        "b_b":   init(ks[7], (1, 4 * H_lstm)),
    }

    # synthetic stand-ins for get_wemb_bert outputs
    wemb_question = init(ks[8], (B, S_src, bert_h), scale=1.0)
    wemb_header = init(ks[9], (N_hdr, T_hdr, bert_h), scale=1.0)
    hdr_lens = jnp.array(hdr_lens_list, jnp.int32)
    # column -> table ids (batch.get_column_ids_tensor())
    col_tids = jnp.array([[0, 0, 1], [0, 0, 0]], jnp.int32)

    enc_padded, col_encodings, enc_lens, column_nums = rat_bert_forward(
        params, wemb_question, wemb_header, hdr_lens,
        q_lens, tab_nums, col_nums, col_tids, hidden)

    jax.block_until_ready(enc_padded)
    jax.block_until_ready(col_encodings)
    assert enc_padded.shape == (B, max(enc_lens), hidden)
    assert col_encodings.shape == (B, max(col_nums), hidden)
    print("KERNEL_OK")
</pallas_src>

<mosaic_0001>
module attributes {stable_mosaic.version = 11 : i64} {
  func.func @_bilstm_kernel(%arg0: i32, %arg1: memref<1x64x128xbf16, #tpu.memory_space<vmem>>, %arg2: memref<4x16x1xf32, #tpu.memory_space<vmem>>, %arg3: memref<1x128x512xbf16, #tpu.memory_space<vmem>>, %arg4: memref<1x128x512xbf16, #tpu.memory_space<vmem>>, %arg5: memref<1x1x512xf32, #tpu.memory_space<vmem>>, %arg6: memref<1x16x128xf32, #tpu.memory_space<vmem>>, %arg7: memref<1x16x128xf32, #tpu.memory_space<vmem>>, %arg8: memref<64x512xf32, #tpu.memory_space<vmem>>) attributes {dimension_semantics = [#tpu.dimension_semantics<parallel>], iteration_bounds = array<i64: 2>, scalar_prefetch = 0 : i64, scratch_operands = 1 : i64, tpu.core_type = #tpu.core_type<tc>, window_params = [{transform_indices = @transform_0, window_bounds = array<i64: 1, 64, 128>}, {pipeline_mode = #tpu.pipeline_mode<synchronous>, transform_indices = @transform_1, window_bounds = array<i64: 4, 16, 1>}, {transform_indices = @transform_2, window_bounds = array<i64: 1, 128, 512>}, {transform_indices = @transform_3, window_bounds = array<i64: 1, 128, 512>}, {transform_indices = @transform_4, window_bounds = array<i64: 1, 1, 512>}, {transform_indices = @transform_5, window_bounds = array<i64: 1, 16, 128>}, {transform_indices = @transform_6, window_bounds = array<i64: 1, 16, 128>}]} {
    %c0 = arith.constant 0 : index
    %c0_0 = arith.constant 0 : index
    %c0_1 = arith.constant 0 : index
    %0 = vector.load %arg1[%c0, %c0_0, %c0_1] : memref<1x64x128xbf16, #tpu.memory_space<vmem>>, vector<1x64x128xbf16>
    %1 = vector.shape_cast %0 : vector<1x64x128xbf16> to vector<64x128xbf16>
    %c0_2 = arith.constant 0 : index
    %c0_3 = arith.constant 0 : index
    %c0_4 = arith.constant 0 : index
    %2 = vector.load %arg3[%c0_2, %c0_3, %c0_4] : memref<1x128x512xbf16, #tpu.memory_space<vmem>>, vector<1x128x512xbf16>
    %3 = vector.shape_cast %2 : vector<1x128x512xbf16> to vector<128x512xbf16>
    %cst = arith.constant dense<0.000000e+00> : vector<64x512xf32>
    %4 = tpu.matmul %1, %3, %cst {dimension_numbers = #tpu.dot_dimension_numbers<[1], [0], [0], [1], [0, 0, 1, 1], [], []>} : vector<64x128xbf16>, vector<128x512xbf16>, vector<64x512xf32> -> vector<64x512xf32>
    %c0_5 = arith.constant 0 : index
    %c0_6 = arith.constant 0 : index
    %5 = vector.load %arg8[%c0_5, %c0_6] : memref<64x512xf32, #tpu.memory_space<vmem>>, vector<64x512xf32>
    tpu.vector_store %arg8[%c0_5, %c0_6], %4 {strides = array<i32>} : memref<64x512xf32, #tpu.memory_space<vmem>>, vector<64x512xf32>,
    %c0_7 = arith.constant 0 : index
    %c0_8 = arith.constant 0 : index
    %c0_9 = arith.constant 0 : index
    %6 = vector.load %arg4[%c0_7, %c0_8, %c0_9] : memref<1x128x512xbf16, #tpu.memory_space<vmem>>, vector<1x128x512xbf16>
    %7 = vector.shape_cast %6 : vector<1x128x512xbf16> to vector<128x512xbf16>
    %c0_10 = arith.constant 0 : index
    %c0_11 = arith.constant 0 : index
    %c0_12 = arith.constant 0 : index
    %8 = vector.load %arg5[%c0_10, %c0_11, %c0_12] : memref<1x1x512xf32, #tpu.memory_space<vmem>>, vector<1x1x512xf32>
    %9 = vector.shape_cast %8 : vector<1x1x512xf32> to vector<1x512xf32>
    %cst_13 = arith.constant 0.000000e+00 : f32
    %10 = vector.broadcast %cst_13 : f32 to vector<16x128xf32>
    %c0_i32 = arith.constant 0 : i32
    %11 = arith.index_cast %c0_i32 : i32 to index
    %c0_14 = arith.constant 0 : index
    %c0_15 = arith.constant 0 : index
    %12 = vector.load %arg2[%11, %c0_14, %c0_15] : memref<4x16x1xf32, #tpu.memory_space<vmem>>, vector<1x16x1xf32>
    %13 = vector.shape_cast %12 : vector<1x16x1xf32> to vector<16x1xf32>
    %c16_i32 = arith.constant 16 : i32
    %14 = arith.muli %c0_i32, %c16_i32 : i32
    %15 = tpu.assume_multiple %14, 8 : i32
    %16 = arith.index_cast %15 : i32 to index
    %c0_16 = arith.constant 0 : index
    %17 = vector.load %arg8[%16, %c0_16] : memref<64x512xf32, #tpu.memory_space<vmem>>, vector<16x512xf32>
    %18 = arith.truncf %10 : vector<16x128xf32> to vector<16x128xbf16>
    %cst_17 = arith.constant dense<0.000000e+00> : vector<16x512xf32>
    %19 = tpu.matmul %18, %7, %cst_17 {dimension_numbers = #tpu.dot_dimension_numbers<[1], [0], [0], [1], [0, 0, 1, 1], [], []>} : vector<16x128xbf16>, vector<128x512xbf16>, vector<16x512xf32> -> vector<16x512xf32>
    %20 = arith.addf %17, %19 : vector<16x512xf32>
    %21 = vector.broadcast %9 : vector<1x512xf32> to vector<16x512xf32>
    %22 = arith.addf %20, %21 : vector<16x512xf32>
    %23 = vector.extract_strided_slice %22 {offsets = [0, 0], sizes = [16, 128], strides = [1, 1]} : vector<16x512xf32> to vector<16x128xf32>
    %24 = arith.negf %23 : vector<16x128xf32>
    %25 = math.exp %24 : vector<16x128xf32>
    %cst_18 = arith.constant 1.000000e+00 : f32
    %26 = vector.broadcast %cst_18 : f32 to vector<16x128xf32>
    %27 = arith.addf %26, %25 : vector<16x128xf32>
    %28 = arith.divf %26, %27 : vector<16x128xf32>
    %29 = vector.extract_strided_slice %22 {offsets = [0, 128], sizes = [16, 128], strides = [1, 1]} : vector<16x512xf32> to vector<16x128xf32>
    %30 = arith.negf %29 : vector<16x128xf32>
    %31 = math.exp %30 : vector<16x128xf32>
    %cst_19 = arith.constant 1.000000e+00 : f32
    %32 = vector.broadcast %cst_19 : f32 to vector<16x128xf32>
    %33 = arith.addf %32, %31 : vector<16x128xf32>
    %34 = arith.divf %32, %33 : vector<16x128xf32>
    %35 = vector.extract_strided_slice %22 {offsets = [0, 256], sizes = [16, 128], strides = [1, 1]} : vector<16x512xf32> to vector<16x128xf32>
    %36 = math.tanh %35 : vector<16x128xf32>
    %37 = vector.extract_strided_slice %22 {offsets = [0, 384], sizes = [16, 128], strides = [1, 1]} : vector<16x512xf32> to vector<16x128xf32>
    %38 = arith.negf %37 : vector<16x128xf32>
    %39 = math.exp %38 : vector<16x128xf32>
    %cst_20 = arith.constant 1.000000e+00 : f32
    %40 = vector.broadcast %cst_20 : f32 to vector<16x128xf32>
    %41 = arith.addf %40, %39 : vector<16x128xf32>
    %42 = arith.divf %40, %41 : vector<16x128xf32>
    %43 = arith.mulf %34, %10 : vector<16x128xf32>
    %44 = arith.mulf %28, %36 : vector<16x128xf32>
    %45 = arith.addf %43, %44 : vector<16x128xf32>
    %46 = math.tanh %45 : vector<16x128xf32>
    %47 = arith.mulf %42, %46 : vector<16x128xf32>
    %48 = vector.broadcast %13 : vector<16x1xf32> to vector<16x128xf32>
    %49 = arith.mulf %48, %47 : vector<16x128xf32>
    %cst_21 = arith.constant 1.000000e+00 : f32
    %50 = vector.broadcast %cst_21 : f32 to vector<16x1xf32>
    %51 = arith.subf %50, %13 : vector<16x1xf32>
    %52 = vector.broadcast %51 : vector<16x1xf32> to vector<16x128xf32>
    %53 = arith.mulf %52, %10 : vector<16x128xf32>
    %54 = arith.addf %49, %53 : vector<16x128xf32>
    %55 = vector.broadcast %13 : vector<16x1xf32> to vector<16x128xf32>
    %56 = arith.mulf %55, %45 : vector<16x128xf32>
    %cst_22 = arith.constant 1.000000e+00 : f32
    %57 = vector.broadcast %cst_22 : f32 to vector<16x1xf32>
    %58 = arith.subf %57, %13 : vector<16x1xf32>
    %59 = vector.broadcast %58 : vector<16x1xf32> to vector<16x128xf32>
    %60 = arith.mulf %59, %10 : vector<16x128xf32>
    %61 = arith.addf %56, %60 : vector<16x128xf32>
    %62 = vector.broadcast %13 : vector<16x1xf32> to vector<16x128xf32>
    %63 = arith.mulf %62, %47 : vector<16x128xf32>
    %64 = arith.addf %10, %63 : vector<16x128xf32>
    %c1_i32 = arith.constant 1 : i32
    %65 = arith.index_cast %c1_i32 : i32 to index
    %c0_23 = arith.constant 0 : index
    %c0_24 = arith.constant 0 : index
    %66 = vector.load %arg2[%65, %c0_23, %c0_24] : memref<4x16x1xf32, #tpu.memory_space<vmem>>, vector<1x16x1xf32>
    %67 = vector.shape_cast %66 : vector<1x16x1xf32> to vector<16x1xf32>
    %c16_i32_25 = arith.constant 16 : i32
    %68 = arith.muli %c1_i32, %c16_i32_25 : i32
    %69 = tpu.assume_multiple %68, 8 : i32
    %70 = arith.index_cast %69 : i32 to index
    %c0_26 = arith.constant 0 : index
    %71 = vector.load %arg8[%70, %c0_26] : memref<64x512xf32, #tpu.memory_space<vmem>>, vector<16x512xf32>
    %72 = arith.truncf %54 : vector<16x128xf32> to vector<16x128xbf16>
    %cst_27 = arith.constant dense<0.000000e+00> : vector<16x512xf32>
    %73 = tpu.matmul %72, %7, %cst_27 {dimension_numbers = #tpu.dot_dimension_numbers<[1], [0], [0], [1], [0, 0, 1, 1], [], []>} : vector<16x128xbf16>, vector<128x512xbf16>, vector<16x512xf32> -> vector<16x512xf32>
    %74 = arith.addf %71, %73 : vector<16x512xf32>
    %75 = vector.broadcast %9 : vector<1x512xf32> to vector<16x512xf32>
    %76 = arith.addf %74, %75 : vector<16x512xf32>
    %77 = vector.extract_strided_slice %76 {offsets = [0, 0], sizes = [16, 128], strides = [1, 1]} : vector<16x512xf32> to vector<16x128xf32>
    %78 = arith.negf %77 : vector<16x128xf32>
    %79 = math.exp %78 : vector<16x128xf32>
    %cst_28 = arith.constant 1.000000e+00 : f32
    %80 = vector.broadcast %cst_28 : f32 to vector<16x128xf32>
    %81 = arith.addf %80, %79 : vector<16x128xf32>
    %82 = arith.divf %80, %81 : vector<16x128xf32>
    %83 = vector.extract_strided_slice %76 {offsets = [0, 128], sizes = [16, 128], strides = [1, 1]} : vector<16x512xf32> to vector<16x128xf32>
    %84 = arith.negf %83 : vector<16x128xf32>
    %85 = math.exp %84 : vector<16x128xf32>
    %cst_29 = arith.constant 1.000000e+00 : f32
    %86 = vector.broadcast %cst_29 : f32 to vector<16x128xf32>
    %87 = arith.addf %86, %85 : vector<16x128xf32>
    %88 = arith.divf %86, %87 : vector<16x128xf32>
    %89 = vector.extract_strided_slice %76 {offsets = [0, 256], sizes = [16, 128], strides = [1, 1]} : vector<16x512xf32> to vector<16x128xf32>
    %90 = math.tanh %89 : vector<16x128xf32>
    %91 = vector.extract_strided_slice %76 {offsets = [0, 384], sizes = [16, 128], strides = [1, 1]} : vector<16x512xf32> to vector<16x128xf32>
    %92 = arith.negf %91 : vector<16x128xf32>
    %93 = math.exp %92 : vector<16x128xf32>
    %cst_30 = arith.constant 1.000000e+00 : f32
    %94 = vector.broadcast %cst_30 : f32 to vector<16x128xf32>
    %95 = arith.addf %94, %93 : vector<16x128xf32>
    %96 = arith.divf %94, %95 : vector<16x128xf32>
    %97 = arith.mulf %88, %61 : vector<16x128xf32>
    %98 = arith.mulf %82, %90 : vector<16x128xf32>
    %99 = arith.addf %97, %98 : vector<16x128xf32>
    %100 = math.tanh %99 : vector<16x128xf32>
    %101 = arith.mulf %96, %100 : vector<16x128xf32>
    %102 = vector.broadcast %67 : vector<16x1xf32> to vector<16x128xf32>
    %103 = arith.mulf %102, %101 : vector<16x128xf32>
    %cst_31 = arith.constant 1.000000e+00 : f32
    %104 = vector.broadcast %cst_31 : f32 to vector<16x1xf32>
    %105 = arith.subf %104, %67 : vector<16x1xf32>
    %106 = vector.broadcast %105 : vector<16x1xf32> to vector<16x128xf32>
    %107 = arith.mulf %106, %54 : vector<16x128xf32>
    %108 = arith.addf %103, %107 : vector<16x128xf32>
    %109 = vector.broadcast %67 : vector<16x1xf32> to vector<16x128xf32>
    %110 = arith.mulf %109, %99 : vector<16x128xf32>
    %cst_32 = arith.constant 1.000000e+00 : f32
    %111 = vector.broadcast %cst_32 : f32 to vector<16x1xf32>
    %112 = arith.subf %111, %67 : vector<16x1xf32>
    %113 = vector.broadcast %112 : vector<16x1xf32> to vector<16x128xf32>
    %114 = arith.mulf %113, %61 : vector<16x128xf32>
    %115 = arith.addf %110, %114 : vector<16x128xf32>
    %116 = vector.broadcast %67 : vector<16x1xf32> to vector<16x128xf32>
    %117 = arith.mulf %116, %101 : vector<16x128xf32>
    %118 = arith.addf %64, %117 : vector<16x128xf32>
    %c2_i32 = arith.constant 2 : i32
    %119 = arith.index_cast %c2_i32 : i32 to index
    %c0_33 = arith.constant 0 : index
    %c0_34 = arith.constant 0 : index
    %120 = vector.load %arg2[%119, %c0_33, %c0_34] : memref<4x16x1xf32, #tpu.memory_space<vmem>>, vector<1x16x1xf32>
    %121 = vector.shape_cast %120 : vector<1x16x1xf32> to vector<16x1xf32>
    %c16_i32_35 = arith.constant 16 : i32
    %122 = arith.muli %c2_i32, %c16_i32_35 : i32
    %123 = tpu.assume_multiple %122, 8 : i32
    %124 = arith.index_cast %123 : i32 to index
    %c0_36 = arith.constant 0 : index
    %125 = vector.load %arg8[%124, %c0_36] : memref<64x512xf32, #tpu.memory_space<vmem>>, vector<16x512xf32>
    %126 = arith.truncf %108 : vector<16x128xf32> to vector<16x128xbf16>
    %cst_37 = arith.constant dense<0.000000e+00> : vector<16x512xf32>
    %127 = tpu.matmul %126, %7, %cst_37 {dimension_numbers = #tpu.dot_dimension_numbers<[1], [0], [0], [1], [0, 0, 1, 1], [], []>} : vector<16x128xbf16>, vector<128x512xbf16>, vector<16x512xf32> -> vector<16x512xf32>
    %128 = arith.addf %125, %127 : vector<16x512xf32>
    %129 = vector.broadcast %9 : vector<1x512xf32> to vector<16x512xf32>
    %130 = arith.addf %128, %129 : vector<16x512xf32>
    %131 = vector.extract_strided_slice %130 {offsets = [0, 0], sizes = [16, 128], strides = [1, 1]} : vector<16x512xf32> to vector<16x128xf32>
    %132 = arith.negf %131 : vector<16x128xf32>
    %133 = math.exp %132 : vector<16x128xf32>
    %cst_38 = arith.constant 1.000000e+00 : f32
    %134 = vector.broadcast %cst_38 : f32 to vector<16x128xf32>
    %135 = arith.addf %134, %133 : vector<16x128xf32>
    %136 = arith.divf %134, %135 : vector<16x128xf32>
    %137 = vector.extract_strided_slice %130 {offsets = [0, 128], sizes = [16, 128], strides = [1, 1]} : vector<16x512xf32> to vector<16x128xf32>
    %138 = arith.negf %137 : vector<16x128xf32>
    %139 = math.exp %138 : vector<16x128xf32>
    %cst_39 = arith.constant 1.000000e+00 : f32
    %140 = vector.broadcast %cst_39 : f32 to vector<16x128xf32>
    %141 = arith.addf %140, %139 : vector<16x128xf32>
    %142 = arith.divf %140, %141 : vector<16x128xf32>
    %143 = vector.extract_strided_slice %130 {offsets = [0, 256], sizes = [16, 128], strides = [1, 1]} : vector<16x512xf32> to vector<16x128xf32>
    %144 = math.tanh %143 : vector<16x128xf32>
    %145 = vector.extract_strided_slice %130 {offsets = [0, 384], sizes = [16, 128], strides = [1, 1]} : vector<16x512xf32> to vector<16x128xf32>
    %146 = arith.negf %145 : vector<16x128xf32>
    %147 = math.exp %146 : vector<16x128xf32>
    %cst_40 = arith.constant 1.000000e+00 : f32
    %148 = vector.broadcast %cst_40 : f32 to vector<16x128xf32>
    %149 = arith.addf %148, %147 : vector<16x128xf32>
    %150 = arith.divf %148, %149 : vector<16x128xf32>
    %151 = arith.mulf %142, %115 : vector<16x128xf32>
    %152 = arith.mulf %136, %144 : vector<16x128xf32>
    %153 = arith.addf %151, %152 : vector<16x128xf32>
    %154 = math.tanh %153 : vector<16x128xf32>
    %155 = arith.mulf %150, %154 : vector<16x128xf32>
    %156 = vector.broadcast %121 : vector<16x1xf32> to vector<16x128xf32>
    %157 = arith.mulf %156, %155 : vector<16x128xf32>
    %cst_41 = arith.constant 1.000000e+00 : f32
    %158 = vector.broadcast %cst_41 : f32 to vector<16x1xf32>
    %159 = arith.subf %158, %121 : vector<16x1xf32>
    %160 = vector.broadcast %159 : vector<16x1xf32> to vector<16x128xf32>
    %161 = arith.mulf %160, %108 : vector<16x128xf32>
    %162 = arith.addf %157, %161 : vector<16x128xf32>
    %163 = vector.broadcast %121 : vector<16x1xf32> to vector<16x128xf32>
    %164 = arith.mulf %163, %153 : vector<16x128xf32>
    %cst_42 = arith.constant 1.000000e+00 : f32
    %165 = vector.broadcast %cst_42 : f32 to vector<16x1xf32>
    %166 = arith.subf %165, %121 : vector<16x1xf32>
    %167 = vector.broadcast %166 : vector<16x1xf32> to vector<16x128xf32>
    %168 = arith.mulf %167, %115 : vector<16x128xf32>
    %169 = arith.addf %164, %168 : vector<16x128xf32>
    %170 = vector.broadcast %121 : vector<16x1xf32> to vector<16x128xf32>
    %171 = arith.mulf %170, %155 : vector<16x128xf32>
    %172 = arith.addf %118, %171 : vector<16x128xf32>
    %c3_i32 = arith.constant 3 : i32
    %173 = arith.index_cast %c3_i32 : i32 to index
    %c0_43 = arith.constant 0 : index
    %c0_44 = arith.constant 0 : index
    %174 = vector.load %arg2[%173, %c0_43, %c0_44] : memref<4x16x1xf32, #tpu.memory_space<vmem>>, vector<1x16x1xf32>
    %175 = vector.shape_cast %174 : vector<1x16x1xf32> to vector<16x1xf32>
    %c16_i32_45 = arith.constant 16 : i32
    %176 = arith.muli %c3_i32, %c16_i32_45 : i32
    %177 = tpu.assume_multiple %176, 8 : i32
    %178 = arith.index_cast %177 : i32 to index
    %c0_46 = arith.constant 0 : index
    %179 = vector.load %arg8[%178, %c0_46] : memref<64x512xf32, #tpu.memory_space<vmem>>, vector<16x512xf32>
    %180 = arith.truncf %162 : vector<16x128xf32> to vector<16x128xbf16>
    %cst_47 = arith.constant dense<0.000000e+00> : vector<16x512xf32>
    %181 = tpu.matmul %180, %7, %cst_47 {dimension_numbers = #tpu.dot_dimension_numbers<[1], [0], [0], [1], [0, 0, 1, 1], [], []>} : vector<16x128xbf16>, vector<128x512xbf16>, vector<16x512xf32> -> vector<16x512xf32>
    %182 = arith.addf %179, %181 : vector<16x512xf32>
    %183 = vector.broadcast %9 : vector<1x512xf32> to vector<16x512xf32>
    %184 = arith.addf %182, %183 : vector<16x512xf32>
    %185 = vector.extract_strided_slice %184 {offsets = [0, 0], sizes = [16, 128], strides = [1, 1]} : vector<16x512xf32> to vector<16x128xf32>
    %186 = arith.negf %185 : vector<16x128xf32>
    %187 = math.exp %186 : vector<16x128xf32>
    %cst_48 = arith.constant 1.000000e+00 : f32
    %188 = vector.broadcast %cst_48 : f32 to vector<16x128xf32>
    %189 = arith.addf %188, %187 : vector<16x128xf32>
    %190 = arith.divf %188, %189 : vector<16x128xf32>
    %191 = vector.extract_strided_slice %184 {offsets = [0, 128], sizes = [16, 128], strides = [1, 1]} : vector<16x512xf32> to vector<16x128xf32>
    %192 = arith.negf %191 : vector<16x128xf32>
    %193 = math.exp %192 : vector<16x128xf32>
    %cst_49 = arith.constant 1.000000e+00 : f32
    %194 = vector.broadcast %cst_49 : f32 to vector<16x128xf32>
    %195 = arith.addf %194, %193 : vector<16x128xf32>
    %196 = arith.divf %194, %195 : vector<16x128xf32>
    %197 = vector.extract_strided_slice %184 {offsets = [0, 256], sizes = [16, 128], strides = [1, 1]} : vector<16x512xf32> to vector<16x128xf32>
    %198 = math.tanh %197 : vector<16x128xf32>
    %199 = vector.extract_strided_slice %184 {offsets = [0, 384], sizes = [16, 128], strides = [1, 1]} : vector<16x512xf32> to vector<16x128xf32>
    %200 = arith.negf %199 : vector<16x128xf32>
    %201 = math.exp %200 : vector<16x128xf32>
    %cst_50 = arith.constant 1.000000e+00 : f32
    %202 = vector.broadcast %cst_50 : f32 to vector<16x128xf32>
    %203 = arith.addf %202, %201 : vector<16x128xf32>
    %204 = arith.divf %202, %203 : vector<16x128xf32>
    %205 = arith.mulf %196, %169 : vector<16x128xf32>
    %206 = arith.mulf %190, %198 : vector<16x128xf32>
    %207 = arith.addf %205, %206 : vector<16x128xf32>
    %208 = math.tanh %207 : vector<16x128xf32>
    %209 = arith.mulf %204, %208 : vector<16x128xf32>
    %210 = vector.broadcast %175 : vector<16x1xf32> to vector<16x128xf32>
    %211 = arith.mulf %210, %209 : vector<16x128xf32>
    %cst_51 = arith.constant 1.000000e+00 : f32
    %212 = vector.broadcast %cst_51 : f32 to vector<16x1xf32>
    %213 = arith.subf %212, %175 : vector<16x1xf32>
    %214 = vector.broadcast %213 : vector<16x1xf32> to vector<16x128xf32>
    %215 = arith.mulf %214, %162 : vector<16x128xf32>
    %216 = arith.addf %211, %215 : vector<16x128xf32>
    %217 = vector.broadcast %175 : vector<16x1xf32> to vector<16x128xf32>
    %218 = arith.mulf %217, %207 : vector<16x128xf32>
    %cst_52 = arith.constant 1.000000e+00 : f32
    %219 = vector.broadcast %cst_52 : f32 to vector<16x1xf32>
    %220 = arith.subf %219, %175 : vector<16x1xf32>
    %221 = vector.broadcast %220 : vector<16x1xf32> to vector<16x128xf32>
    %222 = arith.mulf %221, %169 : vector<16x128xf32>
    %223 = arith.addf %218, %222 : vector<16x128xf32>
    %224 = vector.broadcast %175 : vector<16x1xf32> to vector<16x128xf32>
    %225 = arith.mulf %224, %209 : vector<16x128xf32>
    %226 = arith.addf %172, %225 : vector<16x128xf32>
    %c4_i32 = arith.constant 4 : i32
    %c0_53 = arith.constant 0 : index
    %c0_54 = arith.constant 0 : index
    %c0_55 = arith.constant 0 : index
    %227 = vector.load %arg7[%c0_53, %c0_54, %c0_55] : memref<1x16x128xf32, #tpu.memory_space<vmem>>, vector<1x16x128xf32>
    %228 = vector.shape_cast %227 : vector<1x16x128xf32> to vector<16x128xf32>
    %229 = vector.shape_cast %216 : vector<16x128xf32> to vector<1x16x128xf32>
    tpu.vector_store %arg7[%c0_53, %c0_54, %c0_55], %229 {strides = array<i32>} : memref<1x16x128xf32, #tpu.memory_space<vmem>>, vector<1x16x128xf32>,
    %c0_56 = arith.constant 0 : index
    %c0_57 = arith.constant 0 : index
    %c0_58 = arith.constant 0 : index
    %230 = vector.load %arg6[%c0_56, %c0_57, %c0_58] : memref<1x16x128xf32, #tpu.memory_space<vmem>>, vector<1x16x128xf32>
    %231 = vector.shape_cast %230 : vector<1x16x128xf32> to vector<16x128xf32>
    %232 = vector.shape_cast %226 : vector<16x128xf32> to vector<1x16x128xf32>
    tpu.vector_store %arg6[%c0_56, %c0_57, %c0_58], %232 {strides = array<i32>} : memref<1x16x128xf32, #tpu.memory_space<vmem>>, vector<1x16x128xf32>,
    return
  }
  func.func @transform_0(%arg0: i32) -> (i32, i32, i32) {
    %c0_i32 = arith.constant 0 : i32
    %c0_i32_0 = arith.constant 0 : i32
    %c0_i32_1 = arith.constant 0 : i32
    return %arg0, %c0_i32, %c0_i32_0 : i32, i32, i32
  }
  func.func @transform_1(%arg0: i32) -> (i32, i32, i32) {
    %c0_i32 = arith.constant 0 : i32
    %c0_i32_0 = arith.constant 0 : i32
    %c0_i32_1 = arith.constant 0 : i32
    %c0_i32_2 = arith.constant 0 : i32
    return %c0_i32, %c0_i32_0, %c0_i32_1 : i32, i32, i32
  }
  func.func @transform_2(%arg0: i32) -> (i32, i32, i32) {
    %c0_i32 = arith.constant 0 : i32
    %c0_i32_0 = arith.constant 0 : i32
    %c0_i32_1 = arith.constant 0 : i32
    return %arg0, %c0_i32, %c0_i32_0 : i32, i32, i32
  }
  func.func @transform_3(%arg0: i32) -> (i32, i32, i32) {
    %c0_i32 = arith.constant 0 : i32
    %c0_i32_0 = arith.constant 0 : i32
    %c0_i32_1 = arith.constant 0 : i32
    return %arg0, %c0_i32, %c0_i32_0 : i32, i32, i32
  }
  func.func @transform_4(%arg0: i32) -> (i32, i32, i32) {
    %c0_i32 = arith.constant 0 : i32
    %c0_i32_0 = arith.constant 0 : i32
    %c0_i32_1 = arith.constant 0 : i32
    return %arg0, %c0_i32, %c0_i32_0 : i32, i32, i32
  }
  func.func @transform_5(%arg0: i32) -> (i32, i32, i32) {
    %c0_i32 = arith.constant 0 : i32
    %c0_i32_0 = arith.constant 0 : i32
    %c0_i32_1 = arith.constant 0 : i32
    return %arg0, %c0_i32, %c0_i32_0 : i32, i32, i32
  }
  func.func @transform_6(%arg0: i32) -> (i32, i32, i32) {
    %c0_i32 = arith.constant 0 : i32
    %c0_i32_0 = arith.constant 0 : i32
    %c0_i32_1 = arith.constant 0 : i32
    return %arg0, %c0_i32, %c0_i32_0 : i32, i32, i32
  }
}

</mosaic_0001>

<bundles_post_ra>
// kernel: tpu_custom_call.1
= control target key start
LH: loop header
LB: loop body
LE: loop exit
PB: predicated region body
PF: predicated region fallthrough
CT: control target
= control target key end

     0   :  { %s3930_s0 = inlined_call_operand.vmem [shape: bf16[2,64,128], index: 0, kind: input, shape index: {}]   ;;  %s3931_s1 = inlined_call_operand.vmem [shape: f32[4,16,1], index: 1, kind: input, shape index: {}]   ;;  %s3932_s2 = inlined_call_operand.hbm [shape: bf16[2,128,512], index: 2, kind: input, shape index: {}]   ;;  %s3933_s3 = inlined_call_operand.hbm [shape: bf16[2,128,512], index: 3, kind: input, shape index: {}]   ;;  %s3934_s4 = inlined_call_operand.hbm [shape: f32[2,1,512], index: 4, kind: input, shape index: {}]   ;;  %s3935_s5 = inlined_call_operand.hbm [shape: f32[2,16,128], index: 5, kind: output, shape index: {0}]   ;;  %s3936_s6 = inlined_call_operand.hbm [shape: f32[2,16,128], index: 6, kind: output, shape index: {1}]  }
   0x1   :  { %3955 = sst [smem:[#allocation51_spill]] %s3933_s3 }
   0x2   :  { %12 = vsyncpa [#allocation4], 0 }
   0x3   :  { %14 = vsyncpa [#allocation4 + $0x1], 0 }
   0x4   :  { %15 = vsyncpa [#allocation7], 0 }
   0x5   :  { %17 = vsyncpa [#allocation7 + $0x1], 0 }
   0x6   :  { %18 = vsyncpa [#allocation5], 0 }
   0x7   :  { %20 = vsyncpa [#allocation5 + $0x1], 0 }
   0x8   :  { %21 = vsyncpa [#allocation11], 0 }
   0x9   :  { %23 = vsyncpa [#allocation11 + $0x1], 0  ;;  %s2981_s21 = smov 0   ;;  %s2983_s22 = smov 0  }
   0xa   :  { %s2985_s23 = smov 0   ;;  %s2987_s24 = smov 0  }
   0xb LB: > { %3956 = sst [smem:[#allocation16_spill]] %s2927_s21  ;;  %s3002_s25 = sadd.s32 4294967295, %s2939_s24   ;;  %s2939_s24 = sphi %s2987_s24, %s4039_s24   ;;  %s2935_s23 = sphi %s2985_s23, %s4041_s23   ;;  %s2931_s22 = sphi %s2983_s22, %s4043_s22   ;;  %s2927_s21 = sphi %s2981_s21, %s4042_s21  }
   0xc   : > { %3957 = sst [smem:[#allocation17_spill]] %s2935_s23  ;;  %s2148_s26 = sadd.s32 4294967294, %s2939_s24  }
   0xd   : > { %s3006_s27 = sadd.s32 1, %s2939_s24   ;;  %s83_s28 = sadd.s32 1, %s2935_s23 }
   0xe   : > { %3958 = sst [smem:[#allocation18_spill]] %s3006_s27  ;;  %s80_s29 = ssub.s32 %s2939_s24, %s3006_s27 }
   0xf   : > { %p90_p0 = scmp.ne.s32.totalorder %s2935_s23, %s2931_s22  ;;  %p81_p1 = scmp.eq.s32.totalorder %s80_s29, 0 }
  0x10   : > { %p91_p2 = scmp.eq.s32.totalorder %s2939_s24, 0  ;;  %p96_p3 = scmp.ne.s32.totalorder %s2931_s22, %s2927_s21 }
  0x11   : > { %p97_p4 = scmp.eq.s32.totalorder %s3002_s25, 0  ;;  %p172_p7 = scmp.eq.s32.totalorder %s3002_s25, 1 }
  0x12   : > { %s3018_s30 = scalar_select %p81_p1, %s2935_s23, %s83_s28  }
  0x13   : > { %p92_p5 = por %p91_p2, %p90_p0  ;;  %p3020_p6 = por %p97_p4, %p96_p3 }
  0x14   : > { %3959 = sst [smem:[#allocation19_spill]] %s3018_s30  ;;  %p178_p8 = scmp.eq.s32.totalorder %s2148_s26, 1 }
  0x15   : > { %p2150_p9 = scmp.ge.s32.totalorder %s2939_s24, 2  ;;  %p2577_p10 = scmp.lt.s32.totalorder %s2939_s24, 2 }
  0x16   : > { %p3027_p11 = por %p172_p7, %p90_p0  ;;  %p3031_p12 = por %p178_p8, %p96_p3 }
  0x17   : > { %s3036_s10 = sand.u32 1, %s2935_s23   ;;  %s3938_s11 = sshll.u32 %s2939_s24, 8 }
  0x18   : > { %s3961_s8 = scalar_select %p3027_p11, 1, 0 }
  0x19   : > { %s3963_s9 = scalar_select %p3031_p12, 1, 0 }
  0x1a   : > { %3962 = sst [smem:[#allocation20_spill]] %s3961_s8  ;;  %s3937_s12 = sshll.u32 %s3036_s10, 8 }
  0x1b   : > { %3964 = sst [smem:[#allocation21_spill]] %s3963_s9  ;;  %p3040_p13 = pnand %p2577_p10, %p92_p5 }
  0x1c   : > { %s257_s14 = sand.u32 1, %s2939_s24   ;;  %s3966_s3 = sld [smem:[#allocation51_spill]] }
  0x1d   : > { %s261_s18 = scalar_lea.vmem [#allocation6], %s3937_s12  ;;  %p2159_p0 = scmp.ge.s32.totalorder %s2939_s24, 1 }
  0x1e   : > { %s269_s19 = sshll.u32 %s261_s18, 4  ;;  %s3053_s26 = scalar_lea.sflag [#allocation7], %s257_s14  ;;  %s270_s19 = int_to_ptr.vmem [resolvable:$true] %s269_s19 }
  0x1f   : > { %p2751_p2 = pneg %p3040_p13 }
  0x22   : > { %s266_s17 = scalar_lea.hbm %s3966_s3, %s3938_s11  ;;  %s2754_s18 = scalar_lea.hbm %s3966_s3, 512 }
  0x23   : > { %s267_s20 = sshll.u32 %s266_s17, 4  ;;  %s268_s20 = int_to_ptr.hbm [resolvable:$true] %s267_s20 }
  0x24   : > { %s2747_s28 = sshra.s32 %s268_s20, 4  ;;  %s2748_s28 = int_to_ptr.hbm [resolvable:$true] %s2747_s28 }
  0x25   : > { %s2749_s29 = scalar_lea.hbm %s2748_s28, 256  ;;  %p2755_p5 = scmp.lt.s32.totalorder %s2748_s28, %s3966_s3 }
  0x26   : > { %p2750_p1 = scmp.ne.s32.totalorder %s2748_s28, %s2749_s29  ;;  %p2756_p7 = scmp.lt.s32.totalorder %s2754_s18, %s2749_s29 }
  0x28   : > { %p2752_p3 = pnand %p2751_p2, %p2750_p1  ;;  %p2757_p8 = por %p2756_p7, %p2755_p5 }
  0x2a   : > { %p2753_p4 = pneg %p2752_p3 }
  0x2c   : > { %p2758_p10 = pnand %p2757_p8, %p2753_p4 }
  0x2e   : > { %2761 = shalt.err (!%p2758_p10)
}
  0x2f   : > { %s2941_s14 = smov 256   ;;  %s2942_s11 = smov 16  }
  0x30   : > { %2566 = dma.hbm_to_vmem [thread:$0]  (!%p3040_p13), %s268_s20, 4096, %s270_s19, %s3053_s26, %s2941_s14, %s2941_s14, %s2942_s11  }
  0x31   : > { %p296_p1 = scmp.lt.s32.totalorder %s2939_s24, 3  ;;  %s3967_s12 = sshll.u32 %s2939_s24, 8 }
  0x32   : > { %s244_s15 = scalar_lea.hbm %s3932_s2, %s3967_s12  ;;  %s3969_s17 = sshll.u32 %s3036_s10, 8 }
  0x33   : > { %p3077_p3 = pnand %p2159_p0, %p296_p1  ;;  %s245_s18 = sshll.u32 %s244_s15, 4  ;;  %s246_s18 = int_to_ptr.hbm [resolvable:$true] %s245_s18 }
  0x34   : > { %s239_s3 = scalar_lea.vmem [#allocation3], %s3969_s17  ;;  %s2157_s23 = sshll.u32 %s3036_s10, 2 }
  0x35   : > { %s247_s30 = sshll.u32 %s239_s3, 4  ;;  %s236_s27 = scalar_lea.sflag [#allocation4], %s3036_s10  ;;  %s248_s30 = int_to_ptr.vmem [resolvable:$true] %s247_s30 }
  0x36   : > { %s2777_s19 = sshra.s32 %s246_s18, 4  ;;  %s2784_s29 = scalar_lea.hbm %s3932_s2, 512  ;;  %s2778_s19 = int_to_ptr.hbm [resolvable:$true] %s2777_s19 }
  0x37   : > { %s2779_s20 = scalar_lea.hbm %s2778_s19, 256  ;;  %p2785_p0 = scmp.lt.s32.totalorder %s2778_s19, %s3932_s2 }
  0x38   : > { %p2780_p4 = scmp.ne.s32.totalorder %s2778_s19, %s2779_s20  ;;  %p2786_p8 = scmp.lt.s32.totalorder %s2784_s29, %s2779_s20 }
  0x3a   : > { %p2782_p5 = pnand %p2780_p4, %p2751_p2  ;;  %p2787_p10 = por %p2786_p8, %p2785_p0 }
  0x3c   : > { %p2783_p7 = pneg %p2782_p5 }
  0x3e   : > { %p2788_p1 = pnand %p2787_p10, %p2783_p7 }
  0x40   : > { %2791 = shalt.err (!%p2788_p1)
}
  0x41   : > { %2563 = dma.hbm_to_vmem [thread:$0]  (!%p3040_p13), %s246_s18, 4096, %s248_s30, %s236_s27, %s2941_s14, %s2941_s14, %s2942_s11  }
  0x42   : > { %s2158_s3 = sshll.u32 %s2939_s24, 2  ;;  %s283_s12 = scalar_lea.vmem [#allocation8], %s2157_s23 }
  0x43   : > { %s287_s21 = scalar_lea.hbm %s3934_s4, %s2158_s3  ;;  %s291_s28 = sshll.u32 %s283_s12, 4  ;;  %s292_s28 = int_to_ptr.vmem [resolvable:$true] %s291_s28 }
  0x44   : > { %s289_s8 = sshll.u32 %s287_s21, 4  ;;  %s2814_s30 = scalar_lea.hbm %s3934_s4, 8  ;;  %s290_s8 = int_to_ptr.hbm [resolvable:$true] %s289_s8 }
  0x45   : > { %s2807_s9 = sshra.s32 %s290_s8, 4  ;;  %s2808_s9 = int_to_ptr.hbm [resolvable:$true] %s2807_s9 }
  0x46   : > { %s2809_s19 = scalar_lea.hbm %s2808_s9, 4  ;;  %p2815_p0 = scmp.lt.s32.totalorder %s2808_s9, %s3934_s4 }
  0x47   : > { %p2810_p4 = scmp.ne.s32.totalorder %s2808_s9, %s2809_s19  ;;  %p2816_p8 = scmp.lt.s32.totalorder %s2814_s30, %s2809_s19 }
  0x49   : > { %p2812_p5 = pnand %p2810_p4, %p2751_p2  ;;  %p2817_p10 = por %p2816_p8, %p2815_p0 }
  0x4b   : > { %p2813_p7 = pneg %p2812_p5 }
  0x4d   : > { %p2818_p1 = pnand %p2817_p10, %p2813_p7 }
  0x4f   : > { %2821 = shalt.err (!%p2818_p1)
}
  0x50   : > { %2569 = dma.hbm_to_vmem [thread:$0]  (!%p3040_p13), %s290_s8, 64, %s292_s28, %s3053_s26  }
  0x51   : > { %300 = sbr.rel (%p3077_p3) target bundleno = 961 (0x3c1), region = 40 }
  0x56   : > { %s3115_s21 = sand.u32 1, %s2931_s22  }
  0x57   : > { %s2160_s23 = sshll.u32 %s3115_s21, 8  ;;  %s303_s18 = scalar_lea.sflag [#allocation4], %s3115_s21 }
  0x58   : > { %s3119_s29 = scalar_lea.vmem [#allocation3], %s2160_s23 }
  0x59   : > { %2910 = dma.done.wait (%p3020_p6), %s303_s18, 4096  }
  0x5a   : > { %2912 = vsyncadd (%p3020_p6), %s303_s18, 4294963200  ;;  %s312_s8 = sand.u32 1, %s3002_s25   ;;  %s3126_s26 = scalar_lea.vmem [#allocation6], %s2160_s23 }
  0x5b   : > { %s313_s13 = scalar_lea.sflag [#allocation7], %s312_s8 }
  0x5c   : > { %2914 = dma.done.wait (%p3020_p6), %s313_s13, 4160  }
  0x5d   : > { %2916 = vsyncadd (%p3020_p6), %s313_s13, 4294963136  ;;  %v2297_v0 = vld [vmem:[%s3119_s29 + $0xe0] sm:$0xf]  ;;  %v2514_v1 = vld [vmem:[%s3119_s29 + $0xec] sm:$0xf0]  ;;  %p376_p6 = scmp.lt.s32.totalorder %s3002_s25, 1 }
  0x5e   : > { %v2512_v2 = vld [vmem:[%s3119_s29 + $0xe4] sm:$0xf]  ;;  %v2298_v3 = vor.u32 %v2514_v1, %v2297_v0  ;;  %v2299_v4 = vld [vmem:[%s3119_s29 + $0xf0] sm:$0xf0]  ;;  %v2305_v5 = vld [vmem:[%s3119_s29 + $0xe8] sm:$0xf] }
  0x5f   : > { %v2515_v6 = vld [vmem:[%s3119_s29 + $0xf4] sm:$0xf0]  ;;  %v2302_v7 = vor.u32 %v2512_v2, %v2299_v4  ;;  %v2513_v9 = vld [vmem:[%s3119_s29 + $0xec] sm:$0xf]  ;;  %v2307_v10 = vld [vmem:[%s3119_s29 + $0xf8] sm:$0xf0] }
  0x60   : > { %v2306_v8 = vor.u32 %v2515_v6, %v2305_v5  ;;  %v2281_v11 = vld [vmem:[%s3119_s29 + $0xc0] sm:$0xf]  ;;  %606 = vmatpush.bf16.msra.mxu0 %v2298_v3  ;;  %v2310_v12 = vor.u32 %v2513_v9, %v2307_v10  ;;  %v2510_v13 = vld [vmem:[%s3119_s29 + $0xcc] sm:$0xf0]  ;;  %v2508_v14 = vld [vmem:[%s3119_s29 + $0xc4] sm:$0xf] }
  0x61   : > { %v2283_v15 = vld [vmem:[%s3119_s29 + $0xd0] sm:$0xf0]  ;;  %635 = vmatpush.bf16.msra.mxu1 %v2302_v7  ;;  %v2282_v16 = vor.u32 %v2510_v13, %v2281_v11  ;;  %v2289_v18 = vld [vmem:[%s3119_s29 + $0xc8] sm:$0xf]  ;;  %v2511_v19 = vld [vmem:[%s3119_s29 + $0xd4] sm:$0xf0] }
  0x62   : > { %664 = vmatpush.bf16.msra.mxu2 %v2306_v8  ;;  %v2286_v17 = vor.u32 %v2508_v14, %v2283_v15  ;;  %v2509_v20 = vld [vmem:[%s3119_s29 + $0xcc] sm:$0xf]  ;;  %693 = vmatpush.bf16.msra.mxu3 %v2310_v12  ;;  %v2290_v21 = vor.u32 %v2511_v19, %v2289_v18  ;;  %v2291_v22 = vld [vmem:[%s3119_s29 + $0xd8] sm:$0xf0]  ;;  %v2265_v23 = vld [vmem:[%s3119_s29 + $0xa0] sm:$0xf] }
  0x63   : > { %v2506_v24 = vld [vmem:[%s3119_s29 + $0xac] sm:$0xf0]  ;;  %v2294_v25 = vor.u32 %v2509_v20, %v2291_v22  ;;  %v2504_v26 = vld [vmem:[%s3119_s29 + $0xa4] sm:$0xf]  ;;  %v2267_v27 = vld [vmem:[%s3119_s29 + $0xb0] sm:$0xf0] }
  0x64   : > { %v2273_v28 = vld [vmem:[%s3119_s29 + $0xa8] sm:$0xf]  ;;  %607 = vmatpush.bf16.msra.mxu0 %v2282_v16  ;;  %v2266_v29 = vor.u32 %v2506_v24, %v2265_v23  ;;  %v2507_v30 = vld [vmem:[%s3119_s29 + $0xb4] sm:$0xf0]  ;;  %v2505_v31 = vld [vmem:[%s3119_s29 + $0xac] sm:$0xf]  ;;  %v2270_v33 = vor.u32 %v2504_v26, %v2267_v27 }
  0x65   : > { %v2275_v32 = vld [vmem:[%s3119_s29 + $0xb8] sm:$0xf0]  ;;  %636 = vmatpush.bf16.msra.mxu1 %v2286_v17  ;;  %v2274_v34 = vor.u32 %v2507_v30, %v2273_v28  ;;  %v2249_v35 = vld [vmem:[%s3119_s29 + $0x80] sm:$0xf]  ;;  %v2502_v36 = vld [vmem:[%s3119_s29 + $0x8c] sm:$0xf0] }
  0x66   : > { %665 = vmatpush.bf16.msra.mxu2 %v2290_v21  ;;  %v2500_v37 = vld [vmem:[%s3119_s29 + $0x84] sm:$0xf]  ;;  %694 = vmatpush.bf16.msra.mxu3 %v2294_v25  ;;  %v2278_v38 = vor.u32 %v2505_v31, %v2275_v32  ;;  %v2251_v39 = vld [vmem:[%s3119_s29 + $0x90] sm:$0xf0]  ;;  %v2257_v40 = vld [vmem:[%s3119_s29 + $0x88] sm:$0xf]  ;;  %v2250_v44 = vor.u32 %v2502_v36, %v2249_v35 }
  0x67   : > { %v2503_v41 = vld [vmem:[%s3119_s29 + $0x94] sm:$0xf0]  ;;  %v2501_v42 = vld [vmem:[%s3119_s29 + $0x8c] sm:$0xf]  ;;  %v2259_v43 = vld [vmem:[%s3119_s29 + $0x98] sm:$0xf0]  ;;  %v2254_v45 = vor.u32 %v2500_v37, %v2251_v39 }
  0x68   : > { %608 = vmatpush.bf16.msra.mxu0 %v2266_v29  ;;  %v2258_v46 = vor.u32 %v2503_v41, %v2257_v40  ;;  %v2233_v47 = vld [vmem:[%s3119_s29 + $0x60] sm:$0xf]  ;;  %v2498_v48 = vld [vmem:[%s3119_s29 + $0x6c] sm:$0xf0]  ;;  %v2496_v49 = vld [vmem:[%s3119_s29 + $0x64] sm:$0xf]  ;;  %v2262_v50 = vor.u32 %v2501_v42, %v2259_v43 }
  0x69   : > { %637 = vmatpush.bf16.msra.mxu1 %v2270_v33  ;;  %v2235_v51 = vld [vmem:[%s3119_s29 + $0x70] sm:$0xf0]  ;;  %v2241_v52 = vld [vmem:[%s3119_s29 + $0x68] sm:$0xf]  ;;  %v2499_v53 = vld [vmem:[%s3119_s29 + $0x74] sm:$0xf0]  ;;  %v2234_v56 = vor.u32 %v2498_v48, %v2233_v47 }
  0x6a   : > { %666 = vmatpush.bf16.msra.mxu2 %v2274_v34  ;;  %695 = vmatpush.bf16.msra.mxu3 %v2278_v38  ;;  %v2497_v54 = vld [vmem:[%s3119_s29 + $0x6c] sm:$0xf]  ;;  %v2243_v55 = vld [vmem:[%s3119_s29 + $0x78] sm:$0xf0]  ;;  %v2238_v57 = vor.u32 %v2496_v49, %v2235_v51  ;;  %v2242_v58 = vor.u32 %v2499_v53, %v2241_v52  ;;  %v2217_v59 = vld [vmem:[%s3119_s29 + $0x40] sm:$0xf] }
  0x6b   : > { %v2494_v60 = vld [vmem:[%s3119_s29 + $0x4c] sm:$0xf0]  ;;  %v2492_v61 = vld [vmem:[%s3119_s29 + $0x44] sm:$0xf]  ;;  %v2246_v62 = vor.u32 %v2497_v54, %v2243_v55  ;;  %v2219_v63 = vld [vmem:[%s3119_s29 + $0x50] sm:$0xf0] }
  0x6c   : > { %609 = vmatpush.bf16.msra.mxu0 %v2250_v44  ;;  %v2225_v0 = vld [vmem:[%s3119_s29 + $0x48] sm:$0xf]  ;;  %v2495_v1 = vld [vmem:[%s3119_s29 + $0x54] sm:$0xf0]  ;;  %v2493_v2 = vld [vmem:[%s3119_s29 + $0x4c] sm:$0xf]  ;;  %v2218_v4 = vor.u32 %v2494_v60, %v2217_v59  ;;  %v2222_v5 = vor.u32 %v2492_v61, %v2219_v63 }
  0x6d   : > { %638 = vmatpush.bf16.msra.mxu1 %v2254_v45  ;;  %v2227_v3 = vld [vmem:[%s3119_s29 + $0x58] sm:$0xf0]  ;;  %s3184_s7 = scalar_select %p376_p6, %s3002_s25, 1  ;;  %v2226_v6 = vor.u32 %v2495_v1, %v2225_v0  ;;  %v2201_v7 = vld [vmem:[%s3119_s29 + $0x20] sm:$0xf] }
  0x6e   : > { %667 = vmatpush.bf16.msra.mxu2 %v2258_v46  ;;  %696 = vmatpush.bf16.msra.mxu3 %v2262_v50  ;;  %v2490_v8 = vld [vmem:[%s3119_s29 + $0x2c] sm:$0xf0]  ;;  %v2488_v9 = vld [vmem:[%s3119_s29 + $0x24] sm:$0xf]  ;;  %v2230_v10 = vor.u32 %v2493_v2, %v2227_v3  ;;  %v2203_v11 = vld [vmem:[%s3119_s29 + $0x30] sm:$0xf0] }
  0x6f   : > { %v2209_v12 = vld [vmem:[%s3119_s29 + $0x28] sm:$0xf]  ;;  %v2491_v13 = vld [vmem:[%s3119_s29 + $0x34] sm:$0xf0]  ;;  %v2489_v14 = vld [vmem:[%s3119_s29 + $0x2c] sm:$0xf]  ;;  %v2202_v16 = vor.u32 %v2490_v8, %v2201_v7  ;;  %v2206_v18 = vor.u32 %v2488_v9, %v2203_v11 }
  0x70   : > { %610 = vmatpush.bf16.msra.mxu0 %v2234_v56  ;;  %v2211_v15 = vld [vmem:[%s3119_s29 + $0x38] sm:$0xf0]  ;;  %s2479_s16 = sshll.u32 %s3184_s7, 5  ;;  %v2185_v17 = vld [vmem:[%s3119_s29] sm:$0xf]  ;;  %v2210_v19 = vor.u32 %v2491_v13, %v2209_v12  ;;  %s2162_s7 = sshll.u32 %s3115_s21, 2 }
  0x71   : > { %639 = vmatpush.bf16.msra.mxu1 %v2238_v57  ;;  %v2486_v20 = vld [vmem:[%s3119_s29 + $0xc] sm:$0xf0]  ;;  %v2484_v21 = vld [vmem:[%s3119_s29 + $0x4] sm:$0xf]  ;;  %v2187_v22 = vld [vmem:[%s3119_s29 + $0x10] sm:$0xf0]  ;;  %v2214_v23 = vor.u32 %v2489_v14, %v2211_v15  ;;  %s3205_s10 = scalar_lea.vmem %s3930_s0, %s2479_s16 }
  0x72   : > { %668 = vmatpush.bf16.msra.mxu2 %v2242_v58  ;;  %697 = vmatpush.bf16.msra.mxu3 %v2246_v62  ;;  %v2193_v24 = vld [vmem:[%s3119_s29 + $0x8] sm:$0xf]  ;;  %v2487_v25 = vld [vmem:[%s3119_s29 + $0x14] sm:$0xf0]  ;;  %v2485_v26 = vld [vmem:[%s3119_s29 + $0xc] sm:$0xf]  ;;  %v2186_v30 = vor.u32 %v2486_v20, %v2185_v17  ;;  %v2190_v33 = vor.u32 %v2484_v21, %v2187_v22 }
  0x73   : > { %v2195_v27 = vld [vmem:[%s3119_s29 + $0x18] sm:$0xf0]  ;;  %v2425_v28 = vld [vmem:[%s3126_s26 + $0xe0] sm:$0xf]  ;;  %v2546_v29 = vld [vmem:[%s3126_s26 + $0xec] sm:$0xf0]  ;;  %v2194_v34 = vor.u32 %v2487_v25, %v2193_v24 }
  0x74   : > { %611 = vmatpush.bf16.msra.mxu0 %v2218_v4  ;;  %v2544_v31 = vld [vmem:[%s3126_s26 + $0xe4] sm:$0xf]  ;;  %v2427_v32 = vld [vmem:[%s3126_s26 + $0xf0] sm:$0xf0]  ;;  %v2198_v36 = vor.u32 %v2485_v26, %v2195_v27  ;;  %v3213_v37 = vor.u32 %v2546_v29, %v2425_v28  ;;  %v2545_v38 = vld [vmem:[%s3126_s26 + $0xec] sm:$0xf] }
  0x75   : > { %640 = vmatpush.bf16.msra.mxu1 %v2222_v5  ;;  %v2480_v35 = vld [vmem:[%s3205_s10] sm:$0xff]  ;;  %v2433_v39 = vld [vmem:[%s3126_s26 + $0xe8] sm:$0xf]  ;;  %v2547_v40 = vld [vmem:[%s3126_s26 + $0xf4] sm:$0xf0]  ;;  %v3218_v41 = vor.u32 %v2544_v31, %v2427_v32  ;;  %s326_s16 = scalar_lea.vmem [#allocation8], %s2162_s7 }
  0x76   : > { %669 = vmatpush.bf16.msra.mxu2 %v2226_v6  ;;  %698 = vmatpush.bf16.msra.mxu3 %v2230_v10  ;;  %v2435_v42 = vld [vmem:[%s3126_s26 + $0xf8] sm:$0xf0]  ;;  %v2409_v43 = vld [vmem:[%s3126_s26 + $0xc0] sm:$0xf]  ;;  %v2542_v44 = vld [vmem:[%s3126_s26 + $0xcc] sm:$0xf0]  ;;  %v3225_v47 = vor.u32 %v2547_v40, %v2433_v39 }
  0x77   : > { %v2540_v45 = vld [vmem:[%s3126_s26 + $0xc4] sm:$0xf]  ;;  %v2411_v46 = vld [vmem:[%s3126_s26 + $0xd0] sm:$0xf0]  ;;  %v3228_v48 = vor.u32 %v2545_v38, %v2435_v42  ;;  %v3230_v49 = vor.u32 %v2542_v44, %v2409_v43  ;;  %v2541_v50 = vld [vmem:[%s3126_s26 + $0xcc] sm:$0xf] }
  0x78   : > { %612 = vmatpush.bf16.msra.mxu0 %v2202_v16  ;;  %v2417_v51 = vld [vmem:[%s3126_s26 + $0xc8] sm:$0xf]  ;;  %v2543_v52 = vld [vmem:[%s3126_s26 + $0xd4] sm:$0xf0]  ;;  %v3236_v53 = vor.u32 %v2540_v45, %v2411_v46  ;;  %v2419_v54 = vld [vmem:[%s3126_s26 + $0xd8] sm:$0xf0] }
  0x79   : > { %641 = vmatpush.bf16.msra.mxu1 %v2206_v18  ;;  %v2393_v55 = vld [vmem:[%s3126_s26 + $0xa0] sm:$0xf]  ;;  %v2538_v56 = vld [vmem:[%s3126_s26 + $0xac] sm:$0xf0]  ;;  %v2536_v57 = vld [vmem:[%s3126_s26 + $0xa4] sm:$0xf]  ;;  %v3244_v59 = vor.u32 %v2543_v52, %v2417_v51  ;;  %v3248_v60 = vor.u32 %v2541_v50, %v2419_v54 }
  0x7a   : > { %670 = vmatpush.bf16.msra.mxu2 %v2210_v19  ;;  %699 = vmatpush.bf16.msra.mxu3 %v2214_v23  ;;  %v2395_v58 = vld [vmem:[%s3126_s26 + $0xb0] sm:$0xf0]  ;;  %v3250_v61 = vor.u32 %v2538_v56, %v2393_v55  ;;  %v2537_v62 = vld [vmem:[%s3126_s26 + $0xac] sm:$0xf]  ;;  %v2401_v63 = vld [vmem:[%s3126_s26 + $0xa8] sm:$0xf] }
  0x7b   : > { %v2539_v0 = vld [vmem:[%s3126_s26 + $0xb4] sm:$0xf0]  ;;  %v3256_v1 = vor.u32 %v2536_v57, %v2395_v58  ;;  %v2403_v2 = vld [vmem:[%s3126_s26 + $0xb8] sm:$0xf0]  ;;  %v2377_v3 = vld [vmem:[%s3126_s26 + $0x80] sm:$0xf] }
  0x7c   : > { %613 = vmatpush.bf16.msra.mxu0 %v2186_v30  ;;  %v2534_v4 = vld [vmem:[%s3126_s26 + $0x8c] sm:$0xf0]  ;;  %v2532_v5 = vld [vmem:[%s3126_s26 + $0x84] sm:$0xf]  ;;  %v2379_v6 = vld [vmem:[%s3126_s26 + $0x90] sm:$0xf0]  ;;  %v3264_v7 = vor.u32 %v2539_v0, %v2401_v63  ;;  %v3268_v8 = vor.u32 %v2537_v62, %v2403_v2 }
  0x7d   : > { %642 = vmatpush.bf16.msra.mxu1 %v2190_v33  ;;  %v3270_v9 = vor.u32 %v2534_v4, %v2377_v3  ;;  %v2533_v10 = vld [vmem:[%s3126_s26 + $0x8c] sm:$0xf]  ;;  %v2385_v11 = vld [vmem:[%s3126_s26 + $0x88] sm:$0xf]  ;;  %v2535_v12 = vld [vmem:[%s3126_s26 + $0x94] sm:$0xf0]  ;;  %v3276_v13 = vor.u32 %v2532_v5, %v2379_v6 }
  0x7e   : > { %671 = vmatpush.bf16.msra.mxu2 %v2194_v34  ;;  %700 = vmatpush.bf16.msra.mxu3 %v2198_v36  ;;  %v2387_v14 = vld [vmem:[%s3126_s26 + $0x98] sm:$0xf0]  ;;  %v2361_v15 = vld [vmem:[%s3126_s26 + $0x60] sm:$0xf]  ;;  %v2530_v16 = vld [vmem:[%s3126_s26 + $0x6c] sm:$0xf0]  ;;  %v3285_v20 = vor.u32 %v2535_v12, %v2385_v11 }
  0x7f   : > { %614 = vmatmul.bf16.vlgmr.msra.gmra.mxu0 %v2480_v35  ;;  %v2528_v17 = vld [vmem:[%s3126_s26 + $0x64] sm:$0xf]  ;;  %v2363_v18 = vld [vmem:[%s3126_s26 + $0x70] sm:$0xf0]  ;;  %v2481_v19 = vld [vmem:[%s3205_s10 + $0x8] sm:$0xff]  ;;  %v3289_v21 = vor.u32 %v2533_v10, %v2387_v14  ;;  %v3291_v22 = vor.u32 %v2530_v16, %v2361_v15  ;;  %v2943_v14 = vmov 0  }
  0x80   : > { %960 = vmatpush.bf16.msrb.mxu0 %v3213_v37  ;;  %643 = vmatmul.bf16.vlgmr.msra.gmra.mxu1 %v2480_v35  ;;  %v2529_v23 = vld [vmem:[%s3126_s26 + $0x6c] sm:$0xf]  ;;  %v2369_v24 = vld [vmem:[%s3126_s26 + $0x68] sm:$0xf]  ;;  %v2531_v25 = vld [vmem:[%s3126_s26 + $0x74] sm:$0xf0]  ;;  %v3297_v26 = vor.u32 %v2528_v17, %v2363_v18 }
  0x81   : > { %974 = vmatpush.bf16.msrb.mxu1 %v3218_v41  ;;  %672 = vmatmul.bf16.vlgmr.msra.gmra.mxu2 %v2480_v35  ;;  %v2371_v27 = vld [vmem:[%s3126_s26 + $0x78] sm:$0xf0]  ;;  %v2345_v28 = vld [vmem:[%s3126_s26 + $0x40] sm:$0xf]  ;;  %v2526_v29 = vld [vmem:[%s3126_s26 + $0x4c] sm:$0xf0]  ;;  %v3305_v32 = vor.u32 %v2531_v25, %v2369_v24 }
  0x82   : > { %701 = vmatmul.bf16.vlgmr.msra.gmra.mxu3 %v2480_v35  ;;  %988 = vmatpush.bf16.msrb.mxu2 %v3225_v47  ;;  %v2524_v30 = vld [vmem:[%s3126_s26 + $0x44] sm:$0xf]  ;;  %v2347_v31 = vld [vmem:[%s3126_s26 + $0x50] sm:$0xf0]  ;;  %v3309_v33 = vor.u32 %v2529_v23, %v2371_v27  ;;  %v3311_v34 = vor.u32 %v2526_v29, %v2345_v28  ;;  %v2525_v36 = vld [vmem:[%s3126_s26 + $0x4c] sm:$0xf] }
  0x83   : > { %1002 = vmatpush.bf16.msrb.mxu3 %v3228_v48  ;;  %v3314_v35 = vor.u32 %v2524_v30, %v2347_v31  ;;  %v2355_v38 = vld [vmem:[%s3126_s26 + $0x58] sm:$0xf0]  ;;  %v2329_v39 = vld [vmem:[%s3126_s26 + $0x20] sm:$0xf]  ;;  %v2522_v40 = vld [vmem:[%s3126_s26 + $0x2c] sm:$0xf0]  ;;  %2616 = vset.pattern.permute.xlu0 %v2943_v14 }
  0x84   : > { %961 = vmatpush.bf16.msrb.mxu0 %v3230_v49  ;;  %v2520_v42 = vld [vmem:[%s3126_s26 + $0x24] sm:$0xf]  ;;  %v3324_v43 = vor.u32 %v2525_v36, %v2355_v38  ;;  %v3326_v44 = vor.u32 %v2522_v40, %v2329_v39  ;;  %v2331_v45 = vld [vmem:[%s3126_s26 + $0x30] sm:$0xf0]  ;;  %v2353_v46 = vld [vmem:[%s3126_s26 + $0x48] sm:$0xf]  ;;  %2617 = vset.pattern.permute.xlu1 %v2943_v14 }
  0x85   : > { %975 = vmatpush.bf16.msrb.mxu1 %v3236_v53  ;;  %v2527_v50 = vld [vmem:[%s3126_s26 + $0x54] sm:$0xf0]  ;;  %v3332_v51 = vor.u32 %v2520_v42, %v2331_v45  ;;  %v2521_v54 = vld [vmem:[%s3126_s26 + $0x2c] sm:$0xf]  ;;  %v2339_v55 = vld [vmem:[%s3126_s26 + $0x38] sm:$0xf0]  ;;  %2618 = vset.pattern.permute.xlu2 %v2943_v14 }
  0x86   : > { %989 = vmatpush.bf16.msrb.mxu2 %v3244_v59  ;;  %v3334_v52 = vor.u32 %v2527_v50, %v2353_v46  ;;  %v2313_v56 = vld [vmem:[%s3126_s26] sm:$0xf]  ;;  %v2518_v57 = vld [vmem:[%s3126_s26 + $0xc] sm:$0xf0]  ;;  %v2516_v58 = vld [vmem:[%s3126_s26 + $0x4] sm:$0xf]  ;;  %v3347_v2 = vor.u32 %v2521_v54, %v2339_v55 }
  0x87   : > { %1003 = vmatpush.bf16.msrb.mxu3 %v3248_v60  ;;  %v2315_v62 = vld [vmem:[%s3126_s26 + $0x10] sm:$0xf0]  ;;  %v2337_v63 = vld [vmem:[%s3126_s26 + $0x28] sm:$0xf]  ;;  %v2523_v0 = vld [vmem:[%s3126_s26 + $0x34] sm:$0xf0]  ;;  %v3349_v3 = vor.u32 %v2518_v57, %v2313_v56 }
  0x88   : > { %962 = vmatpush.bf16.msrb.mxu0 %v3250_v61  ;;  %v3351_v4 = vor.u32 %v2523_v0, %v2337_v63  ;;  %v2321_v5 = vld [vmem:[%s3126_s26 + $0x8] sm:$0xf]  ;;  %v2519_v6 = vld [vmem:[%s3126_s26 + $0x14] sm:$0xf0]  ;;  %v3356_v10 = vor.u32 %v2516_v58, %v2315_v62  ;;  %v2517_v11 = vld [vmem:[%s3126_s26 + $0xc] sm:$0xf] }
  0x89   : > { %976 = vmatpush.bf16.msrb.mxu1 %v3256_v1  ;;  %v2323_v12 = vld [vmem:[%s3126_s26 + $0x18] sm:$0xf0]  ;;  %v3363_v15 = vor.u32 %v2519_v6, %v2321_v5  ;;  %v2482_v17 = vld [vmem:[%s3205_s10 + $0x10] sm:$0xff]  ;;  %v787_v18 = vld [vmem:[%s3931_s1] sm:$0xff]  ;;  %s2163_s15 = sshll.u32 %s3115_s21, 4  ;;  %s1947_s18 = scalar_lea.sflag [#allocation5], %s3115_s21 }
  0x8a   : > { %990 = vmatpush.bf16.msrb.mxu2 %v3264_v7  ;;  %v3368_v16 = vor.u32 %v2517_v11, %v2323_v12  ;;  %1169 = vperm.xlu0 %2616, %v787_v18   ;;  %v2445_v23 = vld [vmem:[%s3931_s1 + $0x10] sm:$0xff]  ;;  %v788_v24 = vld [vmem:[%s3931_s1 + $0x8] sm:$0xff]  ;;  %v2483_v27 = vld [vmem:[%s3205_s10 + $0x18] sm:$0xff]  ;;  %s3864_s3 = scalar_lea.vmem [#allocation9], %s2163_s15  ;;  %s2548_s10 = sshll.u32 %s3002_s25, 4 }
  0x8b   : > { %1004 = vmatpush.bf16.msrb.mxu3 %v3268_v8  ;;  %1416 = vperm.xlu2 %2618, %v2445_v23   ;;  %v1180_v25 = vsub.f32 1.0, %v788_v24  ;;  %v2446_v28 = vld [vmem:[%s3931_s1 + $0x18] sm:$0xff]  ;;  %v1426_v29 = vsub.f32 1.0, %v2445_v23  ;;  %v2453_v31 = vld [vmem:[%s3931_s1 + $0x20] sm:$0xff]  ;;  %v2454_v36 = vld [vmem:[%s3931_s1 + $0x28] sm:$0xff]  ;;  %s3868_s17 = scalar_lea.vmem [#allocation10], %s2163_s15  ;;  %s1963_s9 = scalar_lea.hbm %s3935_s5, %s2548_s10 }
  0x8c   : > { %963 = vmatpush.bf16.msrb.mxu0 %v3270_v9  ;;  %v1427_v30 = vsub.f32 1.0, %v2446_v28  ;;  %v1676_v38 = vsub.f32 1.0, %v2454_v36  ;;  %v1675_v39 = vsub.f32 1.0, %v2453_v31  ;;  %v2461_v40 = vld [vmem:[%s3931_s1 + $0x30] sm:$0xff]  ;;  %v2462_v45 = vld [vmem:[%s3931_s1 + $0x38] sm:$0xff]  ;;  %s1964_s25 = sshll.u32 %s3864_s3, 4  ;;  %s1980_s30 = scalar_lea.hbm %s3936_s6, %s2548_s10  ;;  %s1965_s25 = int_to_ptr.vmem [resolvable:$true] %s1964_s25 }
  0x8d   : > { %977 = vmatpush.bf16.msrb.mxu1 %v3276_v13  ;;  %v1924_v42 = vsub.f32 1.0, %v2461_v40  ;;  %v1925_v46 = vsub.f32 1.0, %v2462_v45  ;;  %s1966_s19 = sshll.u32 %s1963_s9, 4  ;;  %s1981_s14 = sshll.u32 %s3868_s17, 4  ;;  %s1967_s19 = int_to_ptr.hbm [resolvable:$true] %s1966_s19  ;;  %s3882_s14 = int_to_ptr.vmem [resolvable:$true] %s1981_s14 }
  0x8e   : > { %991 = vmatpush.bf16.msrb.mxu2 %v3285_v20  ;;  %s1983_s23 = sshll.u32 %s1980_s30, 4  ;;  %s2851_s29 = sshra.s32 %s1967_s19, 4  ;;  %s3884_s23 = int_to_ptr.hbm [resolvable:$true] %s1983_s23  ;;  %s2852_s29 = int_to_ptr.hbm [resolvable:$true] %s2851_s29 }
  0x8f   : > { %1005 = vmatpush.bf16.msrb.mxu3 %v3289_v21  ;;  %619 = vmatmul.bf16.gmra.mxu0 %v2481_v19  ;;  %s2853_s8 = scalar_lea.hbm %s2852_s29, 16  ;;  %s2857_s7 = scalar_lea.hbm %s3935_s5, 32 }
  0x90   : > { %964 = vmatpush.bf16.msrb.mxu0 %v3291_v22  ;;  %648 = vmatmul.bf16.gmra.mxu1 %v2481_v19  ;;  %p2854_p13 = scmp.ne.s32.totalorder %s2852_s29, %s2853_s8  ;;  %p2858_p4 = scmp.lt.s32.totalorder %s2852_s29, %s3935_s5 }
  0x91   : > { %978 = vmatpush.bf16.msrb.mxu1 %v3297_v26  ;;  %677 = vmatmul.bf16.gmra.mxu2 %v2481_v19  ;;  %p2859_p5 = scmp.lt.s32.totalorder %s2857_s7, %s2853_s8 }
  0x92   : > { %706 = vmatmul.bf16.gmra.mxu3 %v2481_v19  ;;  %992 = vmatpush.bf16.msrb.mxu2 %v3305_v32  ;;  %v1179_v19 = vsub.f32 1.0, %v787_v18  ;;  %p2855_p2 = pnand %p2854_p13, %p3027_p11 }
  0x93   : > { %1006 = vmatpush.bf16.msrb.mxu3 %v3309_v33  ;;  %1174 = vperm.xlu0 %2616, %v788_v24   ;;  %p2860_p7 = por %p2859_p5, %p2858_p4 }
  0x94   : > { %965 = vmatpush.bf16.msrb.mxu0 %v3311_v34  ;;  %1183 = vperm.xlu1 %2617, %v1179_v19   ;;  %p2856_p3 = pneg %p2855_p2 }
  0x95   : > { %979 = vmatpush.bf16.msrb.mxu1 %v3314_v35  ;;  %1421 = vperm.xlu2 %2618, %v2446_v28  }
  0x96   : > { %993 = vmatpush.bf16.msrb.mxu2 %v3334_v52  ;;  %p2861_p0 = pnand %p2860_p7, %p2856_p3 }
  0x97   : > { %1007 = vmatpush.bf16.msrb.mxu3 %v3324_v43 }
  0x98   : > { %966 = vmatpush.bf16.msrb.mxu0 %v3326_v44 }
  0x99   : > { %980 = vmatpush.bf16.msrb.mxu1 %v3332_v51 }
  0x9a   : > { %994 = vmatpush.bf16.msrb.mxu2 %v3351_v4 }
  0x9b   : > { %1008 = vmatpush.bf16.msrb.mxu3 %v3347_v2  ;;  %1430 = vperm.xlu0 %2616, %v1426_v29  }
  0x9c   : > { %967 = vmatpush.bf16.msrb.mxu0 %v3349_v3  ;;  %1188 = vperm.xlu1 %2617, %v1180_v25  }
  0x9d   : > { %981 = vmatpush.bf16.msrb.mxu1 %v3356_v10  ;;  %1665 = vperm.xlu2 %2618, %v2453_v31  }
  0x9e   : > { %995 = vmatpush.bf16.msrb.mxu2 %v3363_v15 }
  0x9f   : > { %1009 = vmatpush.bf16.msrb.mxu3 %v3368_v16  ;;  %624 = vmatmul.bf16.gmra.mxu0 %v2482_v17 }
  0xa0   : > { %1216 = vmatpush.bf16.msra.mxu0 %v3213_v37  ;;  %653 = vmatmul.bf16.gmra.mxu1 %v2482_v17 }
  0xa1   : > { %1230 = vmatpush.bf16.msra.mxu1 %v3218_v41  ;;  %682 = vmatmul.bf16.gmra.mxu2 %v2482_v17 }
  0xa2   : > { %1244 = vmatpush.bf16.msra.mxu2 %v3225_v47  ;;  %711 = vmatmul.bf16.gmra.mxu3 %v2482_v17 }
  0xa3   : > { %1258 = vmatpush.bf16.msra.mxu3 %v3228_v48  ;;  %1670 = vperm.xlu0 %2616, %v2454_v36  }
  0xa4   : > { %1217 = vmatpush.bf16.msra.mxu0 %v3230_v49  ;;  %1435 = vperm.xlu1 %2617, %v1427_v30  }
  0xa5   : > { %1231 = vmatpush.bf16.msra.mxu1 %v3236_v53  ;;  %1684 = vperm.xlu2 %2618, %v1676_v38  }
  0xa6   : > { %1245 = vmatpush.bf16.msra.mxu2 %v3244_v59 }
  0xa7   : > { %1259 = vmatpush.bf16.msra.mxu3 %v3248_v60 }
  0xa8   : > { %1218 = vmatpush.bf16.msra.mxu0 %v3250_v61 }
  0xa9   : > { %1232 = vmatpush.bf16.msra.mxu1 %v3256_v1 }
  0xaa   : > { %1246 = vmatpush.bf16.msra.mxu2 %v3264_v7 }
  0xab   : > { %1260 = vmatpush.bf16.msra.mxu3 %v3268_v8  ;;  %1914 = vperm.xlu0 %2616, %v2461_v40  }
  0xac   : > { %1219 = vmatpush.bf16.msra.mxu0 %v3270_v9  ;;  %1679 = vperm.xlu1 %2617, %v1675_v39  }
  0xad   : > { %1233 = vmatpush.bf16.msra.mxu1 %v3276_v13  ;;  %1928 = vperm.xlu2 %2618, %v1924_v42  }
  0xae   : > { %1247 = vmatpush.bf16.msra.mxu2 %v3285_v20 }
  0xaf   : > { %1261 = vmatpush.bf16.msra.mxu3 %v3289_v21  ;;  %629 = vmatmul.bf16.gmra.mxu0 %v2483_v27 }
  0xb0   : > { %1220 = vmatpush.bf16.msra.mxu0 %v3291_v22  ;;  %658 = vmatmul.bf16.gmra.mxu1 %v2483_v27 }
  0xb1   : > { %1234 = vmatpush.bf16.msra.mxu1 %v3297_v26  ;;  %687 = vmatmul.bf16.gmra.mxu2 %v2483_v27 }
  0xb2   : > { %1248 = vmatpush.bf16.msra.mxu2 %v3305_v32  ;;  %716 = vmatmul.bf16.gmra.mxu3 %v2483_v27 }
  0xb3   : > { %1262 = vmatpush.bf16.msra.mxu3 %v3309_v33  ;;  %1933 = vperm.xlu0 %2616, %v1925_v46  }
  0xb4   : > { %1221 = vmatpush.bf16.msra.mxu0 %v3311_v34  ;;  %1919 = vperm.xlu1 %2617, %v2462_v45   ;;  %v786_v45 = vld [vmem:[%s326_s16] sm:$0xf] }
  0xb5   : > { %1235 = vmatpush.bf16.msra.mxu1 %v3314_v35  ;;  %v3518_v46 = vperm.slane %v786_v45, 0 }
  0xb6   : > { %1249 = vmatpush.bf16.msra.mxu2 %v3334_v52 }
  0xb7   : > { %1263 = vmatpush.bf16.msra.mxu3 %v3324_v43  ;;  %3992 = vst [vmem:[#allocation44_spill] sm:$0xff] %v3518_v46 }
  0xb8   : > { %1222 = vmatpush.bf16.msra.mxu0 %v3326_v44 }
  0xb9   : > { %1236 = vmatpush.bf16.msra.mxu1 %v3332_v51 }
  0xba   : > { %1250 = vmatpush.bf16.msra.mxu2 %v3351_v4 }
  0xbb   : > { %1264 = vmatpush.bf16.msra.mxu3 %v3347_v2 }
  0xbc   : > { %1223 = vmatpush.bf16.msra.mxu0 %v3349_v3 }
  0xbd   : > { %1237 = vmatpush.bf16.msra.mxu1 %v3356_v10 }
  0xbe   : > { %1251 = vmatpush.bf16.msra.mxu2 %v3363_v15 }
  0xbf   : > { %1265 = vmatpush.bf16.msra.mxu3 %v3368_v16  ;;  %968 = vmatmul.bf16.vlgmr.msrb.gmra.mxu0 %v2943_v14 }
  0xc0   : > { %982 = vmatmul.bf16.vlgmr.msrb.gmra.mxu1 %v2943_v14  ;;  %1465 = vmatpush.bf16.msrb.mxu0 %v3213_v37 }
  0xc1   : > { %996 = vmatmul.bf16.vlgmr.msrb.gmra.mxu2 %v2943_v14  ;;  %1479 = vmatpush.bf16.msrb.mxu1 %v3218_v41 }
  0xc2   : > { %1010 = vmatmul.bf16.vlgmr.msrb.gmra.mxu3 %v2943_v14  ;;  %1493 = vmatpush.bf16.msrb.mxu2 %v3225_v47 }
  0xc3   : > { %1507 = vmatpush.bf16.msrb.mxu3 %v3228_v48 }
  0xc4   : > { %1466 = vmatpush.bf16.msrb.mxu0 %v3230_v49 }
  0xc5   : > { %1480 = vmatpush.bf16.msrb.mxu1 %v3236_v53 }
  0xc6   : > { %1494 = vmatpush.bf16.msrb.mxu2 %v3244_v59 }
  0xc7   : > { %1508 = vmatpush.bf16.msrb.mxu3 %v3248_v60 }
  0xc8   : > { %1467 = vmatpush.bf16.msrb.mxu0 %v3250_v61 }
  0xc9   : > { %1481 = vmatpush.bf16.msrb.mxu1 %v3256_v1 }
  0xca   : > { %1495 = vmatpush.bf16.msrb.mxu2 %v3264_v7 }
  0xcb   : > { %1509 = vmatpush.bf16.msrb.mxu3 %v3268_v8 }
  0xcc   : > { %1468 = vmatpush.bf16.msrb.mxu0 %v3270_v9 }
  0xcd   : > { %1482 = vmatpush.bf16.msrb.mxu1 %v3276_v13 }
  0xce   : > { %1496 = vmatpush.bf16.msrb.mxu2 %v3285_v20 }
  0xcf   : > { %1510 = vmatpush.bf16.msrb.mxu3 %v3289_v21 }
  0xd0   : > { %1469 = vmatpush.bf16.msrb.mxu0 %v3291_v22 }
  0xd1   : > { %1483 = vmatpush.bf16.msrb.mxu1 %v3297_v26 }
  0xd2   : > { %1497 = vmatpush.bf16.msrb.mxu2 %v3305_v32 }
  0xd3   : > { %1511 = vmatpush.bf16.msrb.mxu3 %v3309_v33 }
  0xd4   : > { %1470 = vmatpush.bf16.msrb.mxu0 %v3311_v34 }
  0xd5   : > { %1484 = vmatpush.bf16.msrb.mxu1 %v3314_v35 }
  0xd6   : > { %1498 = vmatpush.bf16.msrb.mxu2 %v3334_v52 }
  0xd7   : > { %1512 = vmatpush.bf16.msrb.mxu3 %v3324_v43 }
  0xd8   : > { %1471 = vmatpush.bf16.msrb.mxu0 %v3326_v44 }
  0xd9   : > { %1485 = vmatpush.bf16.msrb.mxu1 %v3332_v51 }
  0xda   : > { %1499 = vmatpush.bf16.msrb.mxu2 %v3351_v4 }
  0xdb   : > { %1513 = vmatpush.bf16.msrb.mxu3 %v3347_v2 }
  0xdc   : > { %1472 = vmatpush.bf16.msrb.mxu0 %v3349_v3 }
  0xdd   : > { %1486 = vmatpush.bf16.msrb.mxu1 %v3356_v10 }
  0xde   : > { %1500 = vmatpush.bf16.msrb.mxu2 %v3363_v15 }
  0xdf   : > { %1514 = vmatpush.bf16.msrb.mxu3 %v3368_v16 }
  0xfc   : > { %v615_v50 = vpop.f32.mrf.mxu0 }
  0xfd   : > { %v644_v54 = vpop.f32.mrf.mxu1 }
 0x104   : > { %v3467_v55 = vpop.f32.mrf.mxu2  ;;  %v617_v57 = vpop.f32.mrf.mxu0 }
 0x105   : > { %v702_v56 = vpop.f32.mrf.mxu3  ;;  %v646_v58 = vpop.f32.mrf.mxu1 }
 0x10c   : > { %v3469_v62 = vpop.f32.mrf.mxu2  ;;  %v3473_v0 = vpop.f32.mrf.mxu0 }
 0x10d   : > { %v3471_v63 = vpop.f32.mrf.mxu3  ;;  %3970 = vst [vmem:[#allocation22_spill] sm:$0xff] %v3473_v0  ;;  %v3475_v5 = vpop.f32.mrf.mxu1 }
 0x10e   : > { %3971 = vst [vmem:[#allocation23_spill] sm:$0xff] %v3475_v5 }
 0x114   : > { %v3477_v6 = vpop.f32.mrf.mxu2  ;;  %v3481_v12 = vpop.f32.mrf.mxu0 }
 0x115   : > { %3972 = vst [vmem:[#allocation24_spill] sm:$0xff] %v3477_v6  ;;  %v3479_v11 = vpop.f32.mrf.mxu3  ;;  %v3483_v14 = vpop.f32.mrf.mxu1 }
 0x116   : > { %3973 = vst [vmem:[#allocation25_spill] sm:$0xff] %v3479_v11 }
 0x117   : > { %3974 = vst [vmem:[#allocation26_spill] sm:$0xff] %v3481_v12 }
 0x118   : > { %3975 = vst [vmem:[#allocation27_spill] sm:$0xff] %v3483_v14 }
 0x11c   : > { %v3485_v17 = vpop.f32.mrf.mxu2  ;;  %v3489_v19 = vpop.f32.mrf.mxu0 }
 0x11d   : > { %3976 = vst [vmem:[#allocation28_spill] sm:$0xff] %v3485_v17  ;;  %v3487_v18 = vpop.f32.mrf.mxu3  ;;  %v3491_v23 = vpop.f32.mrf.mxu1 }
 0x11e   : > { %3977 = vst [vmem:[#allocation29_spill] sm:$0xff] %v3487_v18 }
 0x11f   : > { %3978 = vst [vmem:[#allocation30_spill] sm:$0xff] %v3489_v19 }
 0x120   : > { %3979 = vst [vmem:[#allocation31_spill] sm:$0xff] %v3491_v23 }
 0x124   : > { %v3493_v24 = vpop.f32.mrf.mxu2  ;;  %v3497_v27 = vpop.f32.mrf.mxu0 }
 0x125   : > { %3980 = vst [vmem:[#allocation32_spill] sm:$0xff] %v3493_v24  ;;  %v3495_v25 = vpop.f32.mrf.mxu3  ;;  %v3499_v28 = vpop.f32.mrf.mxu1  ;;  %v3522_v24 = vperm.slane %v786_v45, 1 }
 0x126   : > { %3981 = vst [vmem:[#allocation33_spill] sm:$0xff] %v3495_v25  ;;  %v3528_v25 = vperm.slane %v786_v45, 3 }
 0x127   : > { %3982 = vst [vmem:[#allocation34_spill] sm:$0xff] %v3497_v27 }
 0x128   : > { %3983 = vst [vmem:[#allocation35_spill] sm:$0xff] %v3499_v28 }
 0x129   : > { %3994 = vst [vmem:[#allocation46_spill] sm:$0xff] %v3522_v24 }
 0x12a   : > { %3996 = vst [vmem:[#allocation48_spill] sm:$0xff] %v3528_v25 }
 0x12c   : > { %v3501_v29 = vpop.f32.mrf.mxu2  ;;  %v3505_v31 = vpop.f32.mrf.mxu0 }
 0x12d   : > { %3984 = vst [vmem:[#allocation36_spill] sm:$0xff] %v3501_v29  ;;  %v3503_v30 = vpop.f32.mrf.mxu3  ;;  %v3507_v36 = vpop.f32.mrf.mxu1 }
 0x12e   : > { %3985 = vst [vmem:[#allocation37_spill] sm:$0xff] %v3503_v30 }
 0x12f   : > { %3986 = vst [vmem:[#allocation38_spill] sm:$0xff] %v3505_v31 }
 0x130   : > { %3987 = vst [vmem:[#allocation39_spill] sm:$0xff] %v3507_v36 }
 0x134   : > { %v3510_v38 = vpop.f32.mrf.mxu2  ;;  %v3514_v40 = vpop.f32.mrf.mxu0 }
 0x135   : > { %3988 = vst [vmem:[#allocation40_spill] sm:$0xff] %v3510_v38  ;;  %v3512_v39 = vpop.f32.mrf.mxu3  ;;  %v3516_v42 = vpop.f32.mrf.mxu1 }
 0x136   : > { %3989 = vst [vmem:[#allocation41_spill] sm:$0xff] %v3512_v39 }
 0x137   : > { %3990 = vst [vmem:[#allocation42_spill] sm:$0xff] %v3514_v40 }
 0x138   : > { %3991 = vst [vmem:[#allocation43_spill] sm:$0xff] %v3516_v42 }
 0x13c   : > { %v969_v30 = vpop.f32.mrf.mxu0  ;;  %v3524_v28 = vpop.f32.mrf.mxu2 }
 0x13d   : > { %v3520_v29 = vpop.f32.mrf.mxu3  ;;  %v1016_v31 = vadd.f32 %v969_v30, %v615_v50  ;;  %v983_v36 = vpop.f32.mrf.mxu1  ;;  %3995 = vst [vmem:[#allocation47_spill] sm:$0xff] %v3524_v28  ;;  %v3533_v28 = vperm.slane %v786_v45, 2 }
 0x13e   : > { %3993 = vst [vmem:[#allocation45_spill] sm:$0xff] %v3520_v29  ;;  %v1017_v38 = vadd.f32 %v983_v36, %v644_v54 }
 0x13f   : > { %v1033_v39 = vadd.f32 %v3518_v46, %v1016_v31  ;;  %3997 = vst [vmem:[#allocation49_spill] sm:$0xff] %v3533_v28 }
 0x140   : > { %v1034_v40 = vadd.f32 %v3522_v24, %v1017_v38 }
 0x141   : > { %v2439_v27 = vmul.f32 -1.442695, %v1033_v39 }
 0x142   : > { %v2441_v42 = vmul.f32 -1.442695, %v1034_v40 }
 0x143   : > { %2619 = vpow2.f32 %v2439_v27 }
 0x144   : > { %2621 = vpow2.f32 %v2441_v42  ;;  %v971_v29 = vpop.f32.mrf.mxu0  ;;  %v997_v36 = vpop.f32.mrf.mxu2 }
 0x145   : > { %v1011_v23 = vpop.f32.mrf.mxu3  ;;  %v1020_v17 = vadd.f32 %v971_v29, %v617_v57  ;;  %v985_v18 = vpop.f32.mrf.mxu1 }
 0x146   : > { %v1019_v19 = vadd.f32 %v1011_v23, %v702_v56  ;;  %v1021_v50 = vadd.f32 %v985_v18, %v646_v58  ;;  %v1018_v56 = vadd.f32 %v997_v36, %v3467_v55 }
 0x147   : > { %v1037_v54 = vadd.f32 %v3518_v46, %v1020_v17 }
 0x148   : > { %v1036_v30 = vadd.f32 %v3528_v25, %v1019_v19  ;;  %v1038_v31 = vadd.f32 %v3522_v24, %v1021_v50  ;;  %v1035_v17 = vadd.f32 %v3533_v28, %v1018_v56 }
 0x149   : > { %v2620_v38 = vpop.eup %2619  ;;  %v2440_v42 = vmul.f32 -1.442695, %v1037_v54 }
 0x14a   : > { %v2443_v39 = vmul.f32 -1.442695, %v1036_v30  ;;  %v2622_v40 = vpop.eup %2621  ;;  %v1047_v27 = vadd.f32 1.0, %v2620_v38  ;;  %v2442_v57 = vmul.f32 -1.442695, %v1038_v31 }
 0x14b   : > { %v1085_v6 = vadd.f32 1.0, %v2622_v40 }
 0x14c   : > { %2623 = vpow2.f32 %v2443_v39  ;;  %v999_v55 = vpop.f32.mrf.mxu2  ;;  %vm1054_vm2 = vweird.f32 %v1047_v27 }
 0x14d   : > { %2625 = vrcp.f32 %v1047_v27  ;;  %v1013_v58 = vpop.f32.mrf.mxu3  ;;  %vm1092_vm4 = vweird.f32 %v1085_v6 }
 0x14e   : > { %2627 = vrcp.f32 %v1085_v6  ;;  %v1023_v18 = vadd.f32 %v1013_v58, %v3471_v63  ;;  %v1058_v63 = vand.u32 2147483647, %v1047_v27  ;;  %v1022_v58 = vadd.f32 %v999_v55, %v3469_v62 }
 0x14f   : > { %2629 = vpow2.f32 %v2440_v42  ;;  %v1060_v42 = vand.u32 2147483648, %v1047_v27 }
 0x150   : > { %2631 = vpow2.f32 %v2442_v57  ;;  %v1040_v23 = vadd.f32 %v3528_v25, %v1023_v18  ;;  %v1098_v18 = vand.u32 2147483648, %v1085_v6  ;;  %v1039_v62 = vadd.f32 %v3533_v28, %v1022_v58 }
 0x151   : > { %2633 = vtanh.f32 %v1035_v17  ;;  %vm1059_vm5 = vcmp.eq.f32.partialorder %v1058_v63, 8.507059e+37 }
 0x152   : > { %v2624_v19 = vpop.eup %2623  ;;  %v2444_v54 = vmul.f32 -1.442695, %v1040_v23  ;;  %v1096_v23 = vand.u32 2147483647, %v1085_v6 }
 0x153   : > { %v2626_v29 = vpop.eup %2625  ;;  %v3539_v45 = vadd.f32 1.0, %v2624_v19 }
 0x154   : > { %v2628_v50 = vpop.eup %2627  ;;  %v1050_v30 = vmul.f32 %v2626_v29, %v1047_v27  ;;  %vm1055_vm0 = vweird.f32 %v2626_v29  ;;  %vm1097_vm7 = vcmp.eq.f32.partialorder %v1096_v23, 8.507059e+37 }
 0x155   : > { %v2630_v36 = vpop.eup %2629  ;;  %v1088_v31 = vmul.f32 %v2628_v50, %v1085_v6  ;;  %2635 = vrcp.f32 %v3539_v45  ;;  %vm1093_vm1 = vweird.f32 %v2628_v50  ;;  %vm1056_vm3 = vmor %vm1054_vm2, %vm1055_vm0  ;;  %vm1132_vm8 = vweird.f32 %v3539_v45 }
 0x156   : > { %v2632_v38 = vpop.eup %2631  ;;  %v1051_v39 = vsub.f32 1.0, %v1050_v30  ;;  %v3542_v40 = vadd.f32 1.0, %v2630_v36  ;;  %2637 = vpow2.f32 %v2444_v54  ;;  %v1184_v54 = vpop.permute.xlu1 %1183  ;;  %vm1094_vm6 = vmor %vm1092_vm4, %vm1093_vm1 }
 0x157   : > { %v1089_v56 = vsub.f32 1.0, %v1088_v31  ;;  %v3544_v57 = vadd.f32 1.0, %v2632_v38  ;;  %v2634_v30 = vpop.eup %2633  ;;  %v1061_v31 = vor.u32 1.1754944e-38, %v1060_v42  ;;  %v3555_v12 = vmul.f32 0.0, %v1184_v54 }
 0x158   : > { %2639 = vrcp.f32 %v3542_v40  ;;  %v1052_v17 = vmul.f32 %v2626_v29, %v1051_v39  ;;  %vm1069_vm13 = vweird.f32 %v3542_v40 }
 0x159   : > { %2641 = vrcp.f32 %v3544_v57  ;;  %v1090_v19 = vmul.f32 %v2628_v50, %v1089_v56  ;;  %v1099_v56 = vor.u32 1.1754944e-38, %v1098_v18  ;;  %v1138_v18 = vand.u32 2147483648, %v3539_v45 }
 0x15a   : > { %v1053_v36 = vadd.f32 %v2626_v29, %v1052_v17  ;;  %2643 = vtanh.f32 %v1039_v62  ;;  %v1113_v62 = vand.u32 2147483648, %v3544_v57  ;;  %vm1107_vm15 = vweird.f32 %v3544_v57 }
 0x15b   : > { %v3549_v25 = vpop.eup %2635  ;;  %v1091_v38 = vadd.f32 %v2628_v50, %v1090_v19 }
 0x15c   : > { %v1128_v55 = vmul.f32 %v3549_v25, %v3539_v45  ;;  %v1057_v39 = vsel %vm1056_vm3, %v2626_v29, %v1053_v36  ;;  %v2638_v14 = vpop.eup %2637  ;;  %vm1133_vm9 = vweird.f32 %v3549_v25 }
 0x15d   : > { %v1062_v17 = vsel %vm1059_vm5, %v1061_v31, %v1057_v39  ;;  %v1095_v27 = vsel %vm1094_vm6, %v2628_v50, %v1091_v38  ;;  %v3557_v58 = vadd.f32 1.0, %v2638_v14  ;;  %v1073_v14 = vand.u32 2147483647, %v3542_v40  ;;  %v1170_v31 = vpop.permute.xlu0 %1169  ;;  %vm3574_vm12 = vmor %vm1132_vm8, %vm1133_vm9 }
 0x15e   : > { %v2640_v42 = vpop.eup %2639  ;;  %v1100_v19 = vsel %vm1097_vm7, %v1099_v56, %v1095_v27  ;;  %v1129_v6 = vsub.f32 1.0, %v1128_v55  ;;  %v1159_v11 = vmul.f32 %v2634_v30, %v1062_v17  ;;  %v1075_v30 = vand.u32 2147483648, %v3542_v40  ;;  %v1189_v46 = vpop.permute.xlu1 %1188 }
 0x15f   : > { %v2642_v28 = vpop.eup %2641  ;;  %v1065_v24 = vmul.f32 %v2640_v42, %v3542_v40  ;;  %v1157_v29 = vmul.f32 0.0, %v1100_v19  ;;  %2645 = vrcp.f32 %v3557_v58  ;;  %vm1070_vm10 = vweird.f32 %v2640_v42 }
 0x160   : > { %v1103_v63 = vmul.f32 %v2642_v28, %v3544_v57  ;;  %v1130_v50 = vmul.f32 %v3549_v25, %v1129_v6  ;;  %v1136_v56 = vand.u32 2147483647, %v3539_v45  ;;  %vm1108_vm11 = vweird.f32 %v2642_v28  ;;  %v2644_v17 = vpop.eup %2643  ;;  %vm1071_vm14 = vmor %vm1069_vm13, %vm1070_vm10 }
 0x161   : > { %v1066_v23 = vsub.f32 1.0, %v1065_v24  ;;  %v1161_v36 = vadd.f32 %v1159_v11, %v1157_v29  ;;  %v1111_v11 = vand.u32 2147483647, %v3544_v57  ;;  %v1139_v19 = vor.u32 1.1754944e-38, %v1138_v18  ;;  %vm1109_vm1 = vmor %vm1107_vm15, %vm1108_vm11 }
 0x162   : > { %v1104_v38 = vsub.f32 1.0, %v1103_v63  ;;  %v1131_v55 = vadd.f32 %v3549_v25, %v1130_v50  ;;  %vm1074_vm0 = vcmp.eq.f32.partialorder %v1073_v14, 8.507059e+37  ;;  %v1114_v18 = vor.u32 1.1754944e-38, %v1113_v62 }
 0x163   : > { %2647 = vtanh.f32 %v1161_v36  ;;  %v1195_v54 = vmul.f32 %v1170_v31, %v1161_v36  ;;  %v1067_v39 = vmul.f32 %v2640_v42, %v1066_v23  ;;  %v1076_v23 = vor.u32 1.1754944e-38, %v1075_v30 }
 0x164   : > { %v1105_v24 = vmul.f32 %v2642_v28, %v1104_v38  ;;  %v1135_v50 = vsel %vm3574_vm12, %v3549_v25, %v1131_v55  ;;  %vm1137_vm2 = vcmp.eq.f32.partialorder %v1136_v56, 8.507059e+37  ;;  %vm1112_vm3 = vcmp.eq.f32.partialorder %v1111_v11, 8.507059e+37 }
 0x165   : > { %v3579_v6 = vadd.f32 %v1195_v54, %v3555_v12  ;;  %v1068_v29 = vadd.f32 %v2640_v42, %v1067_v39  ;;  %v2646_v63 = vpop.eup %2645  ;;  %v1192_v0 = vmul.f32 0.0, %v1189_v46  ;;  %v1153_v62 = vand.u32 2147483648, %v3557_v58 }
 0x166   : > { %v1106_v36 = vadd.f32 %v2642_v28, %v1105_v24  ;;  %v1143_v45 = vmul.f32 %v2646_v63, %v3557_v58  ;;  %vm1148_vm4 = vweird.f32 %v2646_v63  ;;  %vm1147_vm5 = vweird.f32 %v3557_v58 }
 0x167   : > { %4000 = vst [vmem:[#allocation50_spill] sm:$0xff] %v3579_v6  ;;  %v1072_v38 = vsel %vm1071_vm14, %v2640_v42, %v1068_v29  ;;  %v1140_v6 = vsel %vm1137_vm2, %v1139_v19, %v1135_v50  ;;  %v1175_v42 = vpop.permute.xlu0 %1174  ;;  %vm1149_vm6 = vmor %vm1147_vm5, %vm1148_vm4  ;;  %v1154_v19 = vor.u32 1.1754944e-38, %v1153_v62 }
 0x168   : > { %v1077_v54 = vsel %vm1074_vm0, %v1076_v23, %v1072_v38  ;;  %v1110_v40 = vsel %vm1109_vm1, %v2642_v28, %v1106_v36  ;;  %v1144_v25 = vsub.f32 1.0, %v1143_v45  ;;  %v1151_v28 = vand.u32 2147483647, %v3557_v58  ;;  %v4010_v45 = vld [vmem:[#allocation29_spill] sm:$0xff] }
 0x169   : > { %v2648_v39 = vpop.eup %2647  ;;  %v1115_v27 = vsel %vm1112_vm3, %v1114_v18, %v1110_v40  ;;  %v1160_v55 = vmul.f32 %v2644_v17, %v1077_v54  ;;  %v4011_v40 = vld [vmem:[#allocation49_spill] sm:$0xff] }
 0x16a   : > { %v1165_v30 = vmul.f32 %v2648_v39, %v1140_v6  ;;  %v1158_v24 = vmul.f32 0.0, %v1115_v27  ;;  %v1145_v57 = vmul.f32 %v2646_v63, %v1144_v25  ;;  %vm1152_vm7 = vcmp.eq.f32.partialorder %v1151_v28, 8.507059e+37 }
 0x16c   : > { %v1162_v5 = vadd.f32 %v1160_v55, %v1158_v24  ;;  %v1146_v14 = vadd.f32 %v2646_v63, %v1145_v57  ;;  %v3593_v46 = vmul.f32 %v1170_v31, %v1165_v30  ;;  %v4009_v31 = vld [vmem:[#allocation24_spill] sm:$0xff] }
 0x16e   : > { %2649 = vtanh.f32 %v1162_v5  ;;  %v1196_v56 = vmul.f32 %v1175_v42, %v1162_v5  ;;  %v1150_v17 = vsel %vm1149_vm6, %v2646_v63, %v1146_v14  ;;  %v3599_v5 = vadd.f32 %v3555_v12, %v3593_v46 }
 0x16f   : > { %v1155_v29 = vsel %vm1152_vm7, %v1154_v19, %v1150_v17 }
 0x170   : > { %v3591_v11 = vadd.f32 %v1196_v56, %v1192_v0 }
 0x174   : > { %v2650_v6 = vpop.eup %2649 }
 0x175   : > { %v1166_v50 = vmul.f32 %v2650_v6, %v1155_v29 }
 0x177   : > { %v3595_v23 = vmul.f32 %v1175_v42, %v1166_v50  ;;  %v4012_v50 = vld [vmem:[#allocation28_spill] sm:$0xff] }
 0x179   : > { %v3602_v36 = vadd.f32 %v1192_v0, %v3595_v23 }
 0x17b   : > { %v1215_v58 = vpack.c.bf16 %v3602_v36, %v3599_v5 }
 0x17d   : > { %1224 = vmatmul.bf16.vlgmr.msra.gmra.mxu0 %v1215_v58  ;;  %1238 = vmatmul.bf16.vlgmr.msra.gmra.mxu1 %v1215_v58 }
 0x17e   : > { %1252 = vmatmul.bf16.vlgmr.msra.gmra.mxu2 %v1215_v58  ;;  %1266 = vmatmul.bf16.vlgmr.msra.gmra.mxu3 %v1215_v58 }
 0x17f   : > { %1714 = vmatpush.bf16.msra.mxu0 %v3213_v37  ;;  %1728 = vmatpush.bf16.msra.mxu1 %v3218_v41 }
 0x180   : > { %1742 = vmatpush.bf16.msra.mxu2 %v3225_v47  ;;  %1756 = vmatpush.bf16.msra.mxu3 %v3228_v48  ;;  %v4001_v47 = vld [vmem:[#allocation22_spill] sm:$0xff] }
 0x183   : > { %1715 = vmatpush.bf16.msra.mxu0 %v3230_v49  ;;  %1729 = vmatpush.bf16.msra.mxu1 %v3236_v53  ;;  %v4002_v49 = vld [vmem:[#allocation23_spill] sm:$0xff] }
 0x184   : > { %1743 = vmatpush.bf16.msra.mxu2 %v3244_v59  ;;  %1757 = vmatpush.bf16.msra.mxu3 %v3248_v60  ;;  %v4003_v59 = vld [vmem:[#allocation44_spill] sm:$0xff] }
 0x187   : > { %1716 = vmatpush.bf16.msra.mxu0 %v3250_v61  ;;  %1730 = vmatpush.bf16.msra.mxu1 %v3256_v1  ;;  %v4004_v61 = vld [vmem:[#allocation46_spill] sm:$0xff] }
 0x188   : > { %1744 = vmatpush.bf16.msra.mxu2 %v3264_v7  ;;  %1758 = vmatpush.bf16.msra.mxu3 %v3268_v8 }
 0x18b   : > { %1717 = vmatpush.bf16.msra.mxu0 %v3270_v9  ;;  %1731 = vmatpush.bf16.msra.mxu1 %v3276_v13  ;;  %v4005_v13 = vld [vmem:[#allocation25_spill] sm:$0xff] }
 0x18c   : > { %1745 = vmatpush.bf16.msra.mxu2 %v3285_v20  ;;  %1759 = vmatpush.bf16.msra.mxu3 %v3289_v21 }
 0x18f   : > { %1718 = vmatpush.bf16.msra.mxu0 %v3291_v22  ;;  %1732 = vmatpush.bf16.msra.mxu1 %v3297_v26  ;;  %v4006_v26 = vld [vmem:[#allocation26_spill] sm:$0xff] }
 0x190   : > { %1746 = vmatpush.bf16.msra.mxu2 %v3305_v32  ;;  %1760 = vmatpush.bf16.msra.mxu3 %v3309_v33  ;;  %v4007_v33 = vld [vmem:[#allocation27_spill] sm:$0xff] }
 0x193   : > { %1719 = vmatpush.bf16.msra.mxu0 %v3311_v34  ;;  %1733 = vmatpush.bf16.msra.mxu1 %v3314_v35  ;;  %v4008_v35 = vld [vmem:[#allocation48_spill] sm:$0xff] }
 0x194   : > { %1747 = vmatpush.bf16.msra.mxu2 %v3334_v52  ;;  %1761 = vmatpush.bf16.msra.mxu3 %v3324_v43 }
 0x197   : > { %1720 = vmatpush.bf16.msra.mxu0 %v3326_v44  ;;  %1734 = vmatpush.bf16.msra.mxu1 %v3332_v51 }
 0x198   : > { %1748 = vmatpush.bf16.msra.mxu2 %v3351_v4  ;;  %1762 = vmatpush.bf16.msra.mxu3 %v3347_v2 }
 0x19b   : > { %1721 = vmatpush.bf16.msra.mxu0 %v3349_v3  ;;  %1735 = vmatpush.bf16.msra.mxu1 %v3356_v10 }
 0x19c   : > { %1749 = vmatpush.bf16.msra.mxu2 %v3363_v15  ;;  %1763 = vmatpush.bf16.msra.mxu3 %v3368_v16 }
 0x1fa   : > { %v1225_v37 = vpop.f32.mrf.mxu0  ;;  %v1239_v41 = vpop.f32.mrf.mxu1 }
 0x1fb   : > { %v1272_v48 = vadd.f32 %v1225_v37, %v4001_v47  ;;  %v1273_v53 = vadd.f32 %v1239_v41, %v4002_v49 }
 0x1fd   : > { %v1280_v60 = vadd.f32 %v1272_v48, %v4003_v59  ;;  %v1281_v1 = vadd.f32 %v1273_v53, %v4004_v61 }
 0x1ff   : > { %v2447_v7 = vmul.f32 -1.442695, %v1280_v60  ;;  %v2449_v8 = vmul.f32 -1.442695, %v1281_v1 }
 0x201   : > { %2651 = vpow2.f32 %v2447_v7  ;;  %v1267_v9 = vpop.f32.mrf.mxu3  ;;  %v1253_v3 = vpop.f32.mrf.mxu2 }
 0x202   : > { %2653 = vpow2.f32 %v2449_v8  ;;  %v1275_v20 = vadd.f32 %v1267_v9, %v4005_v13  ;;  %v1227_v21 = vpop.f32.mrf.mxu0  ;;  %v1241_v22 = vpop.f32.mrf.mxu1  ;;  %v1274_v63 = vadd.f32 %v1253_v3, %v4009_v31  ;;  %v4013_v3 = vld [vmem:[#allocation50_spill] sm:$0xff] }
 0x203   : > { %v1276_v32 = vadd.f32 %v1227_v21, %v4006_v26  ;;  %v1277_v34 = vadd.f32 %v1241_v22, %v4007_v33 }
 0x204   : > { %v1283_v43 = vadd.f32 %v1275_v20, %v4008_v35  ;;  %v1282_v39 = vadd.f32 %v1274_v63, %v4011_v40 }
 0x205   : > { %v1284_v44 = vadd.f32 %v1276_v32, %v4003_v59  ;;  %v1285_v51 = vadd.f32 %v1277_v34, %v4004_v61 }
 0x206   : > { %v2451_v52 = vmul.f32 -1.442695, %v1283_v43 }
 0x207   : > { %v2652_v2 = vpop.eup %2651  ;;  %v2448_v4 = vmul.f32 -1.442695, %v1284_v44  ;;  %v2450_v16 = vmul.f32 -1.442695, %v1285_v51 }
 0x208   : > { %v2654_v10 = vpop.eup %2653  ;;  %v1294_v15 = vadd.f32 1.0, %v2652_v2  ;;  %2655 = vpow2.f32 %v2451_v52 }
 0x209   : > { %v1332_v0 = vadd.f32 1.0, %v2654_v10  ;;  %2657 = vpow2.f32 %v2448_v4  ;;  %v1269_v12 = vpop.f32.mrf.mxu3  ;;  %v1255_v42 = vpop.f32.mrf.mxu2 }
 0x20a   : > { %2659 = vrcp.f32 %v1294_v15  ;;  %v1279_v38 = vadd.f32 %v1269_v12, %v4010_v45  ;;  %v1305_v19 = vand.u32 2147483647, %v1294_v15  ;;  %v1307_v6 = vand.u32 2147483648, %v1294_v15 }
 0x20b   : > { %2661 = vrcp.f32 %v1332_v0  ;;  %v1278_v58 = vadd.f32 %v1255_v42, %v4012_v50  ;;  %v1345_v41 = vand.u32 2147483648, %v1332_v0  ;;  %v1343_v48 = vand.u32 2147483647, %v1332_v0 }
 0x20c   : > { %2663 = vpow2.f32 %v2450_v16  ;;  %v1287_v25 = vadd.f32 %v1279_v38, %v4008_v35  ;;  %vm1301_vm10 = vweird.f32 %v1294_v15  ;;  %vm1339_vm11 = vweird.f32 %v1332_v0  ;;  %v1417_v38 = vpop.permute.xlu2 %1416 }
 0x20d   : > { %vm1306_vm13 = vcmp.eq.f32.partialorder %v1305_v19, 8.507059e+37  ;;  %v1308_v1 = vor.u32 1.1754944e-38, %v1307_v6  ;;  %v1286_v8 = vadd.f32 %v1278_v58, %v4011_v40  ;;  %v1346_v21 = vor.u32 1.1754944e-38, %v1345_v41 }
 0x20e   : > { %v2656_v18 = vpop.eup %2655  ;;  %v2452_v17 = vmul.f32 -1.442695, %v1287_v25  ;;  %vm1344_vm15 = vcmp.eq.f32.partialorder %v1343_v48, 8.507059e+37  ;;  %v1436_v48 = vpop.permute.xlu1 %1435 }
 0x20f   : > { %v2658_v54 = vpop.eup %2657  ;;  %v3651_v27 = vadd.f32 1.0, %v2656_v18 }
 0x210   : > { %v2660_v55 = vpop.eup %2659  ;;  %v3654_v30 = vadd.f32 1.0, %v2658_v54 }
 0x211   : > { %v2662_v24 = vpop.eup %2661  ;;  %v1297_v57 = vmul.f32 %v2660_v55, %v1294_v15  ;;  %2665 = vrcp.f32 %v3651_v27  ;;  %vm1302_vm8 = vweird.f32 %v2660_v55  ;;  %v3673_v15 = vpop.permute.xlu0 %1430  ;;  %v1385_v58 = vand.u32 2147483648, %v3651_v27 }
 0x212   : > { %v2664_v14 = vpop.eup %2663  ;;  %v1335_v62 = vmul.f32 %v2662_v24, %v1332_v0  ;;  %2667 = vrcp.f32 %v3654_v30  ;;  %vm1340_vm9 = vweird.f32 %v2662_v24  ;;  %vm1303_vm12 = vmor %vm1301_vm10, %vm1302_vm8  ;;  %v1322_v51 = vand.u32 2147483648, %v3654_v30 }
 0x213   : > { %2669 = vtanh.f32 %v1282_v39  ;;  %v3658_v56 = vadd.f32 1.0, %v2664_v14  ;;  %v1298_v28 = vsub.f32 1.0, %v1297_v57  ;;  %vm1341_vm14 = vmor %vm1339_vm11, %vm1340_vm9  ;;  %v1320_v10 = vand.u32 2147483647, %v3654_v30 }
 0x214   : > { %v1336_v29 = vsub.f32 1.0, %v1335_v62  ;;  %v1444_v31 = vmul.f32 %v3673_v15, %v4013_v3  ;;  %vm1316_vm1 = vweird.f32 %v3654_v30  ;;  %v1323_v54 = vor.u32 1.1754944e-38, %v1322_v51 }
 0x215   : > { %2671 = vrcp.f32 %v3658_v56  ;;  %v1299_v37 = vmul.f32 %v2660_v55, %v1298_v28  ;;  %v1360_v39 = vand.u32 2147483648, %v3658_v56  ;;  %vm1321_vm4 = vcmp.eq.f32.partialorder %v1320_v10, 8.507059e+37 }
 0x216   : > { %v1337_v47 = vmul.f32 %v2662_v24, %v1336_v29  ;;  %2673 = vpow2.f32 %v2452_v17  ;;  %vm1354_vm5 = vweird.f32 %v3658_v56  ;;  %vm1379_vm9 = vweird.f32 %v3651_v27 }
 0x217   : > { %v3662_v49 = vpop.eup %2665  ;;  %v1300_v53 = vadd.f32 %v2660_v55, %v1299_v37  ;;  %2675 = vtanh.f32 %v1286_v8  ;;  %v1361_v17 = vor.u32 1.1754944e-38, %v1360_v39 }
 0x218   : > { %v2668_v60 = vpop.eup %2667  ;;  %v1338_v7 = vadd.f32 %v2662_v24, %v1337_v47  ;;  %v1375_v22 = vmul.f32 %v3662_v49, %v3651_v27  ;;  %vm1380_vm8 = vweird.f32 %v3662_v49 }
 0x219   : > { %v2670_v9 = vpop.eup %2669  ;;  %v1312_v13 = vmul.f32 %v2668_v60, %v3654_v30  ;;  %v1304_v20 = vsel %vm1303_vm12, %v2660_v55, %v1300_v53  ;;  %vm1317_vm0 = vweird.f32 %v2668_v60  ;;  %vm3694_vm10 = vmor %vm1379_vm9, %vm1380_vm8 }
 0x21a   : > { %v1309_v26 = vsel %vm1306_vm13, %v1308_v1, %v1304_v20  ;;  %v1342_v32 = vsel %vm1341_vm14, %v2662_v24, %v1338_v7  ;;  %v1376_v16 = vsub.f32 1.0, %v1375_v22  ;;  %vm1318_vm2 = vmor %vm1316_vm1, %vm1317_vm0  ;;  %v1358_v24 = vand.u32 2147483647, %v3658_v56 }
 0x21b   : > { %v2672_v33 = vpop.eup %2671  ;;  %v1347_v34 = vsel %vm1344_vm15, %v1346_v21, %v1342_v32  ;;  %v1406_v43 = vmul.f32 %v2670_v9, %v1309_v26  ;;  %v1313_v44 = vsub.f32 1.0, %v1312_v13  ;;  %v1445_v7 = vmul.f32 %v1436_v48, %v3591_v11  ;;  %v1422_v13 = vpop.permute.xlu2 %1421 }
 0x21c   : > { %v2674_v52 = vpop.eup %2673  ;;  %v1350_v2 = vmul.f32 %v2672_v33, %v3658_v56  ;;  %v1404_v4 = vmul.f32 %v1347_v34, %v4013_v3  ;;  %vm1355_vm3 = vweird.f32 %v2672_v33  ;;  %v1377_v57 = vmul.f32 %v3662_v49, %v1376_v16 }
 0x21d   : > { %v3675_v0 = vadd.f32 1.0, %v2674_v52  ;;  %v1314_v12 = vmul.f32 %v2668_v60, %v1313_v44  ;;  %v2676_v14 = vpop.eup %2675  ;;  %vm1356_vm6 = vmor %vm1354_vm5, %vm1355_vm3  ;;  %vm1359_vm7 = vcmp.eq.f32.partialorder %v1358_v24, 8.507059e+37  ;;  %v1383_v56 = vand.u32 2147483647, %v3651_v27 }
 0x21e   : > { %v1408_v63 = vadd.f32 %v1406_v43, %v1404_v4  ;;  %v1351_v45 = vsub.f32 1.0, %v1350_v2  ;;  %v1378_v50 = vadd.f32 %v3662_v49, %v1377_v57  ;;  %v1386_v9 = vor.u32 1.1754944e-38, %v1385_v58 }
 0x21f   : > { %2677 = vrcp.f32 %v3675_v0  ;;  %v1315_v18 = vadd.f32 %v2668_v60, %v1314_v12  ;;  %v1400_v20 = vand.u32 2147483648, %v3675_v0  ;;  %vm1384_vm12 = vcmp.eq.f32.partialorder %v1383_v56, 8.507059e+37 }
 0x220   : > { %v1442_v25 = vmul.f32 %v1417_v38, %v1408_v63  ;;  %v1352_v55 = vmul.f32 %v2672_v33, %v1351_v45  ;;  %2679 = vtanh.f32 %v1408_v63  ;;  %v1382_v8 = vsel %vm3694_vm10, %v3662_v49, %v1378_v50 }
 0x221   : > { %v1319_v42 = vsel %vm1318_vm2, %v2668_v60, %v1315_v18  ;;  %v1398_v26 = vand.u32 2147483647, %v3675_v0  ;;  %v1387_v32 = vsel %vm1384_vm12, %v1386_v9, %v1382_v8  ;;  %vm1394_vm13 = vweird.f32 %v3675_v0  ;;  %v4022_v9 = vld [vmem:[#allocation37_spill] sm:$0xff] }
 0x222   : > { %v3684_v30 = vadd.f32 %v1444_v31, %v1442_v25  ;;  %v1324_v62 = vsel %vm1321_vm4, %v1323_v54, %v1319_v42  ;;  %v1353_v28 = vadd.f32 %v2672_v33, %v1352_v55  ;;  %v1401_v43 = vor.u32 1.1754944e-38, %v1400_v20  ;;  %v4018_v55 = vld [vmem:[#allocation33_spill] sm:$0xff] }
 0x223   : > { %v1407_v6 = vmul.f32 %v2676_v14, %v1324_v62  ;;  %vm1399_vm15 = vcmp.eq.f32.partialorder %v1398_v26, 8.507059e+37  ;;  %v1438_v3 = vmul.f32 %v3673_v15, %v3599_v5  ;;  %v1439_v4 = vmul.f32 %v1436_v48, %v3602_v36  ;;  %v4016_v5 = vld [vmem:[#allocation30_spill] sm:$0xff]  ;;  %v4017_v36 = vld [vmem:[#allocation31_spill] sm:$0xff]  ;;  %v4021_v48 = vld [vmem:[#allocation32_spill] sm:$0xff] }
 0x224   : > { %v1357_v19 = vsel %vm1356_vm6, %v2672_v33, %v1353_v28  ;;  %v4019_v14 = vld [vmem:[#allocation34_spill] sm:$0xff]  ;;  %v4020_v28 = vld [vmem:[#allocation35_spill] sm:$0xff] }
 0x225   : > { %v2678_v29 = vpop.eup %2677  ;;  %v1362_v37 = vsel %vm1359_vm7, %v1361_v17, %v1357_v19 }
 0x226   : > { %v1390_v41 = vmul.f32 %v2678_v29, %v3675_v0  ;;  %v1405_v47 = vmul.f32 %v1362_v37, %v3591_v11  ;;  %v2680_v21 = vpop.eup %2679  ;;  %vm1395_vm11 = vweird.f32 %v2678_v29 }
 0x227   : > { %v1412_v34 = vmul.f32 %v2680_v21, %v1387_v32  ;;  %vm1396_vm14 = vmor %vm1394_vm13, %vm1395_vm11 }
 0x228   : > { %v1391_v60 = vsub.f32 1.0, %v1390_v41  ;;  %v1409_v1 = vadd.f32 %v1407_v6, %v1405_v47 }
 0x229   : > { %v3707_v52 = vmul.f32 %v1417_v38, %v1412_v34 }
 0x22a   : > { %v1392_v22 = vmul.f32 %v2678_v29, %v1391_v60  ;;  %2681 = vtanh.f32 %v1409_v1  ;;  %v1443_v27 = vmul.f32 %v1422_v13, %v1409_v1 }
 0x22b   : > { %v3715_v16 = vadd.f32 %v1438_v3, %v3707_v52 }
 0x22c   : > { %v1393_v33 = vadd.f32 %v2678_v29, %v1392_v22  ;;  %v3705_v11 = vadd.f32 %v1445_v7, %v1443_v27 }
 0x22e   : > { %v1397_v49 = vsel %vm1396_vm14, %v2678_v29, %v1393_v33 }
 0x22f   : > { %v1402_v51 = vsel %vm1399_vm15, %v1401_v43, %v1397_v49  ;;  %v4023_v43 = vld [vmem:[#allocation36_spill] sm:$0xff] }
 0x230   : > { %v2682_v44 = vpop.eup %2681 }
 0x231   : > { %v1413_v2 = vmul.f32 %v2682_v44, %v1402_v51 }
 0x233   : > { %v3712_v10 = vmul.f32 %v1422_v13, %v1413_v2 }
 0x235   : > { %v3718_v0 = vadd.f32 %v1439_v4, %v3712_v10 }
 0x237   : > { %v1464_v12 = vpack.c.bf16 %v3718_v0, %v3715_v16 }
 0x239   : > { %1473 = vmatmul.bf16.vlgmr.msrb.gmra.mxu0 %v1464_v12  ;;  %1487 = vmatmul.bf16.vlgmr.msrb.gmra.mxu1 %v1464_v12 }
 0x23a   : > { %1501 = vmatmul.bf16.vlgmr.msrb.gmra.mxu2 %v1464_v12  ;;  %1515 = vmatmul.bf16.vlgmr.msrb.gmra.mxu3 %v1464_v12 }
 0x2b6   : > { %v1474_v31 = vpop.f32.mrf.mxu0  ;;  %v1488_v63 = vpop.f32.mrf.mxu1 }
 0x2b7   : > { %v1521_v15 = vadd.f32 %v1474_v31, %v4016_v5  ;;  %v1522_v45 = vadd.f32 %v1488_v63, %v4017_v36 }
 0x2b9   : > { %v1529_v38 = vadd.f32 %v1521_v15, %v4003_v59  ;;  %v1530_v18 = vadd.f32 %v1522_v45, %v4004_v61 }
 0x2bb   : > { %v2455_v54 = vmul.f32 -1.442695, %v1529_v38  ;;  %v2457_v39 = vmul.f32 -1.442695, %v1530_v18 }
 0x2bd   : > { %2683 = vpow2.f32 %v2455_v54  ;;  %v1516_v25 = vpop.f32.mrf.mxu3  ;;  %v1502_v19 = vpop.f32.mrf.mxu2 }
 0x2be   : > { %2685 = vpow2.f32 %v2457_v39  ;;  %v1524_v24 = vadd.f32 %v1516_v25, %v4018_v55  ;;  %v1476_v57 = vpop.f32.mrf.mxu0  ;;  %v1490_v42 = vpop.f32.mrf.mxu1  ;;  %v1523_v53 = vadd.f32 %v1502_v19, %v4021_v48 }
 0x2bf   : > { %v1525_v62 = vadd.f32 %v1476_v57, %v4019_v14  ;;  %v1526_v17 = vadd.f32 %v1490_v42, %v4020_v28 }
 0x2c0   : > { %v1532_v6 = vadd.f32 %v1524_v24, %v4008_v35  ;;  %v1531_v8 = vadd.f32 %v1523_v53, %v4011_v40 }
 0x2c1   : > { %v1533_v29 = vadd.f32 %v1525_v62, %v4003_v59  ;;  %v1534_v50 = vadd.f32 %v1526_v17, %v4004_v61 }
 0x2c2   : > { %v2459_v58 = vmul.f32 -1.442695, %v1532_v6 }
 0x2c3   : > { %v2684_v37 = vpop.eup %2683  ;;  %v2456_v41 = vmul.f32 -1.442695, %v1533_v29  ;;  %v2458_v60 = vmul.f32 -1.442695, %v1534_v50 }
 0x2c4   : > { %v2686_v47 = vpop.eup %2685  ;;  %v1543_v56 = vadd.f32 1.0, %v2684_v37  ;;  %2687 = vpow2.f32 %v2459_v58 }
 0x2c5   : > { %v1581_v1 = vadd.f32 1.0, %v2686_v47  ;;  %2689 = vpow2.f32 %v2456_v41  ;;  %v1518_v7 = vpop.f32.mrf.mxu3  ;;  %v1504_v21 = vpop.f32.mrf.mxu2 }
 0x2c6   : > { %2691 = vrcp.f32 %v1543_v56  ;;  %v1528_v13 = vadd.f32 %v1518_v7, %v4022_v9  ;;  %v1527_v44 = vadd.f32 %v1504_v21, %v4023_v43  ;;  %v1554_v4 = vand.u32 2147483647, %v1543_v56 }
 0x2c7   : > { %2693 = vrcp.f32 %v1581_v1  ;;  %v1556_v12 = vand.u32 2147483648, %v1543_v56  ;;  %v1594_v5 = vand.u32 2147483648, %v1581_v1  ;;  %v1592_v15 = vand.u32 2147483647, %v1581_v1 }
 0x2c8   : > { %2695 = vpow2.f32 %v2458_v60  ;;  %v1536_v33 = vadd.f32 %v1528_v13, %v4008_v35  ;;  %v1535_v38 = vadd.f32 %v1527_v44, %v4011_v40  ;;  %vm1550_vm2 = vweird.f32 %v1543_v56 }
 0x2c9   : > { %2697 = vtanh.f32 %v1531_v8  ;;  %vm1588_vm3 = vweird.f32 %v1581_v1  ;;  %vm1555_vm4 = vcmp.eq.f32.partialorder %v1554_v4, 8.507059e+37  ;;  %v1595_v24 = vor.u32 1.1754944e-38, %v1594_v5 }
 0x2ca   : > { %v2688_v20 = vpop.eup %2687  ;;  %v2460_v36 = vmul.f32 -1.442695, %v1536_v33  ;;  %v1557_v57 = vor.u32 1.1754944e-38, %v1556_v12  ;;  %vm1593_vm7 = vcmp.eq.f32.partialorder %v1592_v15, 8.507059e+37 }
 0x2cb   : > { %v2690_v22 = vpop.eup %2689  ;;  %v3735_v27 = vadd.f32 1.0, %v2688_v20 }
 0x2cc   : > { %v2692_v26 = vpop.eup %2691  ;;  %v3737_v32 = vadd.f32 1.0, %v2690_v22  ;;  %v3763_v22 = vpop.permute.xlu2 %1665 }
 0x2cd   : > { %v2694_v34 = vpop.eup %2693  ;;  %v1546_v49 = vmul.f32 %v2692_v26, %v1543_v56  ;;  %2699 = vrcp.f32 %v3735_v27  ;;  %vm1551_vm0 = vweird.f32 %v2692_v26  ;;  %vm1628_vm8 = vweird.f32 %v3735_v27 }
 0x2ce   : > { %v2696_v51 = vpop.eup %2695  ;;  %v1584_v2 = vmul.f32 %v2694_v34, %v1581_v1  ;;  %2701 = vrcp.f32 %v3737_v32  ;;  %vm1589_vm1 = vweird.f32 %v2694_v34  ;;  %vm1552_vm5 = vmor %vm1550_vm2, %vm1551_vm0  ;;  %v1571_v41 = vand.u32 2147483648, %v3737_v32 }
 0x2cf   : > { %v1547_v3 = vsub.f32 1.0, %v1546_v49  ;;  %v3743_v31 = vadd.f32 1.0, %v2696_v51  ;;  %v2698_v18 = vpop.eup %2697  ;;  %vm1590_vm6 = vmor %vm1588_vm3, %vm1589_vm1  ;;  %v1634_v48 = vand.u32 2147483648, %v3735_v27  ;;  %vm1565_vm9 = vweird.f32 %v3737_v32 }
 0x2d0   : > { %v1585_v63 = vsub.f32 1.0, %v1584_v2  ;;  %v1569_v7 = vand.u32 2147483647, %v3737_v32  ;;  %v1572_v33 = vor.u32 1.1754944e-38, %v1571_v41  ;;  %v1632_v51 = vand.u32 2147483647, %v3735_v27  ;;  %v1680_v41 = vpop.permute.xlu1 %1679 }
 0x2d1   : > { %v1548_v45 = vmul.f32 %v2692_v26, %v1547_v3  ;;  %2703 = vrcp.f32 %v3743_v31  ;;  %v1609_v13 = vand.u32 2147483648, %v3743_v31  ;;  %v1607_v43 = vand.u32 2147483647, %v3743_v31 }
 0x2d2   : > { %v1586_v54 = vmul.f32 %v2694_v34, %v1585_v63  ;;  %2705 = vpow2.f32 %v2460_v36  ;;  %vm1570_vm14 = vcmp.eq.f32.partialorder %v1569_v7, 8.507059e+37  ;;  %vm1603_vm0 = vweird.f32 %v3743_v31 }
 0x2d3   : > { %v3747_v39 = vpop.eup %2699  ;;  %v1549_v25 = vadd.f32 %v2692_v26, %v1548_v45  ;;  %2707 = vtanh.f32 %v1535_v38  ;;  %v1635_v63 = vor.u32 1.1754944e-38, %v1634_v48  ;;  %vm1608_vm2 = vcmp.eq.f32.partialorder %v1607_v43, 8.507059e+37  ;;  %v4028_v43 = vld [vmem:[#allocation41_spill] sm:$0xff] }
 0x2d4   : > { %v2702_v55 = vpop.eup %2701  ;;  %v1587_v42 = vadd.f32 %v2694_v34, %v1586_v54  ;;  %v1624_v14 = vmul.f32 %v3747_v39, %v3735_v27  ;;  %vm1629_vm11 = vweird.f32 %v3747_v39  ;;  %vm1633_vm3 = vcmp.eq.f32.partialorder %v1632_v51, 8.507059e+37 }
 0x2d5   : > { %v1553_v62 = vsel %vm1552_vm5, %v2692_v26, %v1549_v25  ;;  %v1561_v28 = vmul.f32 %v2702_v55, %v3737_v32  ;;  %vm1566_vm10 = vweird.f32 %v2702_v55  ;;  %vm3775_vm15 = vmor %vm1628_vm8, %vm1629_vm11  ;;  %v1610_v32 = vor.u32 1.1754944e-38, %v1609_v13 }
 0x2d6   : > { %v1558_v17 = vsel %vm1555_vm4, %v1557_v57, %v1553_v62  ;;  %v1591_v19 = vsel %vm1590_vm6, %v2694_v34, %v1587_v42  ;;  %v1625_v6 = vsub.f32 1.0, %v1624_v14  ;;  %vm1567_vm13 = vmor %vm1565_vm9, %vm1566_vm10  ;;  %v1685_v57 = vpop.permute.xlu2 %1684 }
 0x2d7   : > { %v2704_v29 = vpop.eup %2703  ;;  %v1596_v50 = vsel %vm1593_vm7, %v1595_v24, %v1591_v19  ;;  %v1655_v58 = vmul.f32 %v2698_v18, %v1558_v17  ;;  %v1562_v37 = vsub.f32 1.0, %v1561_v28  ;;  %v1448_v24 = vadd.f32 %v3707_v52, %v3593_v46 }
 0x2d8   : > { %v1653_v47 = vmul.f32 %v1596_v50, %v3684_v30  ;;  %v1626_v56 = vmul.f32 %v3747_v39, %v1625_v6  ;;  %v1599_v53 = vmul.f32 %v2704_v29, %v3743_v31  ;;  %v2706_v60 = vpop.eup %2705  ;;  %vm1604_vm12 = vweird.f32 %v2704_v29 }
 0x2d9   : > { %v1563_v1 = vmul.f32 %v2702_v55, %v1562_v37  ;;  %v1622_v20 = vadd.f32 1.0, %v2706_v60  ;;  %v2708_v21 = vpop.eup %2707  ;;  %vm1605_vm1 = vmor %vm1603_vm0, %vm1604_vm12  ;;  %v1694_v42 = vmul.f32 %v1685_v57, %v3705_v11  ;;  %v1688_v48 = vmul.f32 %v1685_v57, %v3718_v0 }
 0x2da   : > { %v3760_v8 = vadd.f32 %v1655_v58, %v1653_v47  ;;  %v1600_v9 = vsub.f32 1.0, %v1599_v53  ;;  %v1627_v34 = vadd.f32 %v3747_v39, %v1626_v56  ;;  %v1687_v47 = vmul.f32 %v1680_v41, %v3715_v16 }
 0x2db   : > { %v1564_v26 = vadd.f32 %v2702_v55, %v1563_v1  ;;  %v1649_v28 = vand.u32 2147483648, %v1622_v20  ;;  %v1647_v6 = vand.u32 2147483647, %v1622_v20  ;;  %vm1643_vm5 = vweird.f32 %v1622_v20 }
 0x2dc   : > { %2709 = vtanh.f32 %v3760_v8  ;;  %v1601_v49 = vmul.f32 %v2704_v29, %v1600_v9  ;;  %v1631_v12 = vsel %vm3775_vm15, %v3747_v39, %v1627_v34  ;;  %v1449_v56 = vadd.f32 %v3712_v10, %v3595_v23  ;;  %v4027_v10 = vld [vmem:[#allocation39_spill] sm:$0xff] }
 0x2dd   : > { %v1568_v44 = vsel %vm1567_vm13, %v2702_v55, %v1564_v26  ;;  %2711 = vrcp.f32 %v1622_v20  ;;  %v1636_v38 = vsel %vm1633_vm3, %v1635_v63, %v1631_v12  ;;  %v1671_v55 = vpop.permute.xlu0 %1670  ;;  %v1650_v46 = vor.u32 1.1754944e-38, %v1649_v28 }
 0x2de   : > { %v1573_v3 = vsel %vm1570_vm14, %v1572_v33, %v1568_v44  ;;  %v1602_v4 = vadd.f32 %v2704_v29, %v1601_v49  ;;  %vm1648_vm7 = vcmp.eq.f32.partialorder %v1647_v6, 8.507059e+37 }
 0x2df   : > { %v1656_v15 = vmul.f32 %v2708_v21, %v1573_v3  ;;  %v4029_v3 = vld [vmem:[#allocation42_spill] sm:$0xff] }
 0x2e0   : > { %v1606_v5 = vsel %vm1605_vm1, %v2704_v29, %v1602_v4 }
 0x2e1   : > { %v1611_v36 = vsel %vm1608_vm2, %v1610_v32, %v1606_v5  ;;  %v4030_v32 = vld [vmem:[#allocation43_spill] sm:$0xff] }
 0x2e2   : > { %v2710_v27 = vpop.eup %2709  ;;  %v1654_v45 = vmul.f32 %v1611_v36, %v3705_v11 }
 0x2e3   : > { %v2712_v18 = vpop.eup %2711  ;;  %v1661_v31 = vmul.f32 %v2710_v27, %v1636_v38 }
 0x2e4   : > { %v1658_v54 = vadd.f32 %v1656_v15, %v1654_v45  ;;  %v1639_v25 = vmul.f32 %v2712_v18, %v1622_v20  ;;  %vm1644_vm4 = vweird.f32 %v2712_v18  ;;  %v4026_v20 = vld [vmem:[#allocation38_spill] sm:$0xff] }
 0x2e5   : > { %v1673_v39 = vmul.f32 %v3763_v22, %v1661_v31  ;;  %vm1645_vm6 = vmor %vm1643_vm5, %vm1644_vm4 }
 0x2e6   : > { %2713 = vtanh.f32 %v1658_v54  ;;  %v1692_v14 = vmul.f32 %v1671_v55, %v1658_v54  ;;  %v1640_v62 = vsub.f32 1.0, %v1639_v25 }
 0x2e7   : > { %v3788_v17 = vadd.f32 %v1673_v39, %v1448_v24  ;;  %v3796_v60 = vadd.f32 %v1687_v47, %v1673_v39  ;;  %v4033_v47 = vld [vmem:[#allocation47_spill] sm:$0xff] }
 0x2e8   : > { %v1641_v19 = vmul.f32 %v2712_v18, %v1640_v62  ;;  %v3790_v29 = vadd.f32 %v1694_v42, %v1692_v14  ;;  %v4032_v62 = vld [vmem:[#allocation45_spill] sm:$0xff] }
 0x2ea   : > { %v1642_v50 = vadd.f32 %v2712_v18, %v1641_v19 }
 0x2ec   : > { %v2714_v52 = vpop.eup %2713  ;;  %v1646_v58 = vsel %vm1645_vm6, %v2712_v18, %v1642_v50 }
 0x2ed   : > { %v1651_v37 = vsel %vm1648_vm7, %v1650_v46, %v1646_v58  ;;  %v1693_v46 = vmul.f32 %v1680_v41, %v3684_v30 }
 0x2ee   : > { %v1662_v11 = vmul.f32 %v2714_v52, %v1651_v37  ;;  %v1691_v37 = vmul.f32 %v3763_v22, %v3760_v8 }
 0x2f0   : > { %v1674_v53 = vmul.f32 %v1671_v55, %v1662_v11  ;;  %v4031_v55 = vld [vmem:[#allocation40_spill] sm:$0xff]  ;;  %v1695_v22 = vadd.f32 %v1693_v46, %v1691_v37 }
 0x2f2   : > { %v3798_v1 = vadd.f32 %v1688_v48, %v1674_v53  ;;  %v3800_v7 = vadd.f32 %v1674_v53, %v1449_v56 }
 0x2f4   : > { %v1713_v9 = vpack.c.bf16 %v3798_v1, %v3796_v60 }
 0x2f6   : > { %1722 = vmatmul.bf16.vlgmr.msra.gmra.mxu0 %v1713_v9  ;;  %1736 = vmatmul.bf16.vlgmr.msra.gmra.mxu1 %v1713_v9 }
 0x2f7   : > { %1750 = vmatmul.bf16.vlgmr.msra.gmra.mxu2 %v1713_v9  ;;  %1764 = vmatmul.bf16.vlgmr.msra.gmra.mxu3 %v1713_v9 }
 0x373   : > { %v1723_v16 = vpop.f32.mrf.mxu0  ;;  %v1737_v13 = vpop.f32.mrf.mxu1 }
 0x374   : > { %v1770_v23 = vadd.f32 %v1723_v16, %v4026_v20  ;;  %v1771_v0 = vadd.f32 %v1737_v13, %v4027_v10 }
 0x376   : > { %v1778_v21 = vadd.f32 %v1770_v23, %v4003_v59  ;;  %v1779_v26 = vadd.f32 %v1771_v0, %v4004_v61 }
 0x378   : > { %v2463_v33 = vmul.f32 -1.442695, %v1778_v21  ;;  %v2465_v34 = vmul.f32 -1.442695, %v1779_v26 }
 0x37a   : > { %2715 = vpow2.f32 %v2463_v33  ;;  %v1765_v49 = vpop.f32.mrf.mxu3  ;;  %v1751_v5 = vpop.f32.mrf.mxu2 }
 0x37b   : > { %2717 = vpow2.f32 %v2465_v34  ;;  %v1773_v44 = vadd.f32 %v1765_v49, %v4028_v43  ;;  %v1725_v51 = vpop.f32.mrf.mxu0  ;;  %v1739_v2 = vpop.f32.mrf.mxu1  ;;  %v1772_v24 = vadd.f32 %v1751_v5, %v4031_v55 }
 0x37c   : > { %v1774_v4 = vadd.f32 %v1725_v51, %v4029_v3  ;;  %v1775_v12 = vadd.f32 %v1739_v2, %v4030_v32 }
 0x37d   : > { %v1781_v63 = vadd.f32 %v1773_v44, %v4008_v35 }
 0x37e   : > { %v1782_v15 = vadd.f32 %v1774_v4, %v4003_v59  ;;  %v1783_v36 = vadd.f32 %v1775_v12, %v4004_v61  ;;  %v1780_v59 = vadd.f32 %v1772_v24, %v4011_v40 }
 0x37f   : > { %v2467_v27 = vmul.f32 -1.442695, %v1781_v63 }
 0x380   : > { %v2716_v45 = vpop.eup %2715  ;;  %v2464_v38 = vmul.f32 -1.442695, %v1782_v15  ;;  %v2466_v54 = vmul.f32 -1.442695, %v1783_v36 }
 0x381   : > { %v2718_v18 = vpop.eup %2717  ;;  %v1792_v31 = vadd.f32 1.0, %v2716_v45  ;;  %2719 = vpow2.f32 %v2467_v27 }
 0x382   : > { %v1830_v25 = vadd.f32 1.0, %v2718_v18  ;;  %2721 = vpow2.f32 %v2464_v38  ;;  %v1767_v57 = vpop.f32.mrf.mxu3  ;;  %v1753_v14 = vpop.f32.mrf.mxu2 }
 0x383   : > { %2723 = vrcp.f32 %v1792_v31  ;;  %v1777_v28 = vadd.f32 %v1767_v57, %v4032_v62  ;;  %v1776_v56 = vadd.f32 %v1753_v14, %v4033_v47  ;;  %v1803_v41 = vand.u32 2147483647, %v1792_v31 }
 0x384   : > { %2725 = vrcp.f32 %v1830_v25  ;;  %v1843_v30 = vand.u32 2147483648, %v1830_v25  ;;  %v1805_v13 = vand.u32 2147483648, %v1792_v31  ;;  %v1841_v23 = vand.u32 2147483647, %v1830_v25 }
 0x385   : > { %2727 = vpow2.f32 %v2466_v54  ;;  %v1785_v9 = vadd.f32 %v1777_v28, %v4008_v35  ;;  %vm1799_vm10 = vweird.f32 %v1792_v31  ;;  %vm1837_vm11 = vweird.f32 %v1830_v25 }
 0x386   : > { %v1784_v21 = vadd.f32 %v1776_v56, %v4011_v40  ;;  %vm1804_vm13 = vcmp.eq.f32.partialorder %v1803_v41, 8.507059e+37  ;;  %v1806_v33 = vor.u32 1.1754944e-38, %v1805_v13  ;;  %v1844_v44 = vor.u32 1.1754944e-38, %v1843_v30  ;;  %v1915_v30 = vpop.permute.xlu0 %1914  ;;  %v1929_v41 = vpop.permute.xlu2 %1928 }
 0x387   : > { %v2720_v39 = vpop.eup %2719  ;;  %v2468_v35 = vmul.f32 -1.442695, %v1785_v9  ;;  %vm1842_vm15 = vcmp.eq.f32.partialorder %v1841_v23, 8.507059e+37  ;;  %v1936_v23 = vmul.f32 %v1929_v41, %v3796_v60 }
 0x388   : > { %v2722_v42 = vpop.eup %2721  ;;  %v3816_v61 = vadd.f32 1.0, %v2720_v39 }
 0x389   : > { %v2724_v19 = vpop.eup %2723  ;;  %v3819_v6 = vadd.f32 1.0, %v2722_v42 }
 0x38a   : > { %v2726_v50 = vpop.eup %2725  ;;  %v1795_v52 = vmul.f32 %v2724_v19, %v1792_v31  ;;  %2729 = vrcp.f32 %v3816_v61  ;;  %vm1800_vm8 = vweird.f32 %v2724_v19  ;;  %v1883_v45 = vand.u32 2147483648, %v3816_v61 }
 0x38b   : > { %v2728_v58 = vpop.eup %2727  ;;  %v1833_v11 = vmul.f32 %v2726_v50, %v1830_v25  ;;  %2731 = vtanh.f32 %v1780_v59  ;;  %vm1838_vm9 = vweird.f32 %v2726_v50  ;;  %vm1801_vm12 = vmor %vm1799_vm10, %vm1800_vm8  ;;  %vm1814_vm0 = vweird.f32 %v3819_v6 }
 0x38c   : > { %v1796_v48 = vsub.f32 1.0, %v1795_v52  ;;  %2733 = vrcp.f32 %v3819_v6  ;;  %v3827_v53 = vadd.f32 1.0, %v2728_v58  ;;  %vm1839_vm14 = vmor %vm1837_vm11, %vm1838_vm9  ;;  %v1818_v38 = vand.u32 2147483647, %v3819_v6 }
 0x38d   : > { %v1834_v16 = vsub.f32 1.0, %v1833_v11  ;;  %v1820_v18 = vand.u32 2147483648, %v3819_v6  ;;  %vm1877_vm4 = vweird.f32 %v3816_v61  ;;  %v1881_v62 = vand.u32 2147483647, %v3816_v61 }
 0x38e   : > { %v1797_v20 = vmul.f32 %v2724_v19, %v1796_v48  ;;  %2735 = vrcp.f32 %v3827_v53  ;;  %v1858_v57 = vand.u32 2147483648, %v3827_v53  ;;  %v1856_v39 = vand.u32 2147483647, %v3827_v53 }
 0x38f   : > { %v1835_v8 = vmul.f32 %v2726_v50, %v1834_v16  ;;  %2737 = vpow2.f32 %v2468_v35  ;;  %v1821_v28 = vor.u32 1.1754944e-38, %v1820_v18  ;;  %vm1852_vm7 = vweird.f32 %v3827_v53 }
 0x390   : > { %v3831_v10 = vpop.eup %2729  ;;  %v1798_v0 = vadd.f32 %v2724_v19, %v1797_v20  ;;  %2739 = vtanh.f32 %v1784_v21  ;;  %vm1819_vm8 = vcmp.eq.f32.partialorder %v1818_v38, 8.507059e+37  ;;  %v1884_v37 = vor.u32 1.1754944e-38, %v1883_v45 }
 0x391   : > { %v2732_v26 = vpop.eup %2731  ;;  %v1836_v34 = vadd.f32 %v2726_v50, %v1835_v8  ;;  %v1873_v49 = vmul.f32 %v3831_v10, %v3816_v61  ;;  %vm1878_vm2 = vweird.f32 %v3831_v10  ;;  %v1859_v61 = vor.u32 1.1754944e-38, %v1858_v57 }
 0x392   : > { %v2734_v43 = vpop.eup %2733  ;;  %v1802_v51 = vsel %vm1801_vm12, %v2724_v19, %v1798_v0  ;;  %vm3852_vm6 = vmor %vm1877_vm4, %vm1878_vm2  ;;  %vm1857_vm10 = vcmp.eq.f32.partialorder %v1856_v39, 8.507059e+37  ;;  %vm1882_vm11 = vcmp.eq.f32.partialorder %v1881_v62, 8.507059e+37 }
 0x393   : > { %v1807_v2 = vsel %vm1804_vm13, %v1806_v33, %v1802_v51  ;;  %v1840_v3 = vsel %vm1839_vm14, %v2726_v50, %v1836_v34  ;;  %v1874_v4 = vsub.f32 1.0, %v1873_v49  ;;  %v1810_v40 = vmul.f32 %v2734_v43, %v3819_v6  ;;  %v1920_v51 = vpop.permute.xlu1 %1919 }
 0x394   : > { %v2736_v32 = vpop.eup %2735  ;;  %v1845_v12 = vsel %vm1842_vm15, %v1844_v44, %v1840_v3  ;;  %v1904_v63 = vmul.f32 %v2732_v26, %v1807_v2  ;;  %vm1815_vm1 = vweird.f32 %v2734_v43  ;;  %v1934_v44 = vpop.permute.xlu0 %1933 }
 0x395   : > { %v1902_v5 = vmul.f32 %v1845_v12, %v1695_v22  ;;  %v1875_v15 = vmul.f32 %v3831_v10, %v1874_v4  ;;  %v1811_v36 = vsub.f32 1.0, %v1810_v40  ;;  %v1848_v27 = vmul.f32 %v2736_v32, %v3827_v53  ;;  %v2738_v55 = vpop.eup %2737  ;;  %vm1816_vm5 = vmor %vm1814_vm0, %vm1815_vm1 }
 0x396   : > { %vm1853_vm3 = vweird.f32 %v2736_v32  ;;  %v2740_v14 = vpop.eup %2739  ;;  %v1871_v19 = vadd.f32 1.0, %v2738_v55  ;;  %v1937_v2 = vmul.f32 %v1934_v44, %v3798_v1 }
 0x397   : > { %v1906_v31 = vadd.f32 %v1904_v63, %v1902_v5  ;;  %v1849_v54 = vsub.f32 1.0, %v1848_v27  ;;  %v1812_v25 = vmul.f32 %v2734_v43, %v1811_v36  ;;  %v1876_v24 = vadd.f32 %v3831_v10, %v1875_v15  ;;  %vm1854_vm9 = vmor %vm1852_vm7, %vm1853_vm3 }
 0x398   : > { %v1898_v35 = vand.u32 2147483648, %v1871_v19  ;;  %v1896_v26 = vand.u32 2147483647, %v1871_v19  ;;  %vm1892_vm13 = vweird.f32 %v1871_v19 }
 0x399   : > { %2741 = vtanh.f32 %v1906_v31  ;;  %v1850_v59 = vmul.f32 %v2736_v32, %v1849_v54  ;;  %v1813_v42 = vadd.f32 %v2734_v43, %v1812_v25  ;;  %v1880_v58 = vsel %vm3852_vm6, %v3831_v10, %v1876_v24 }
 0x39a   : > { %2743 = vrcp.f32 %v1871_v19  ;;  %v1885_v53 = vsel %vm1882_vm11, %v1884_v37, %v1880_v58  ;;  %v1899_v33 = vor.u32 1.1754944e-38, %v1898_v35  ;;  %vm1897_vm15 = vcmp.eq.f32.partialorder %v1896_v26, 8.507059e+37 }
 0x39b   : > { %v1817_v46 = vsel %vm1816_vm5, %v2734_v43, %v1813_v42  ;;  %v1851_v52 = vadd.f32 %v2736_v32, %v1850_v59 }
 0x39c   : > { %v1822_v6 = vsel %vm1819_vm8, %v1821_v28, %v1817_v46 }
 0x39d   : > { %v1855_v11 = vsel %vm1854_vm9, %v2736_v32, %v1851_v52  ;;  %v1905_v47 = vmul.f32 %v2740_v14, %v1822_v6 }
 0x39e   : > { %v1860_v56 = vsel %vm1857_vm10, %v1859_v61, %v1855_v11 }
 0x39f   : > { %v2742_v48 = vpop.eup %2741  ;;  %v1903_v9 = vmul.f32 %v1860_v56, %v3790_v29 }
 0x3a0   : > { %v1910_v16 = vmul.f32 %v2742_v48, %v1885_v53  ;;  %v2744_v20 = vpop.eup %2743 }
 0x3a1   : > { %v1907_v13 = vadd.f32 %v1905_v47, %v1903_v9  ;;  %v1888_v22 = vmul.f32 %v2744_v20, %v1871_v19  ;;  %vm1893_vm12 = vweird.f32 %v2744_v20 }
 0x3a2   : > { %v1922_v8 = vmul.f32 %v1915_v30, %v1910_v16  ;;  %vm1894_vm14 = vmor %vm1892_vm13, %vm1893_vm12 }
 0x3a3   : > { %2745 = vtanh.f32 %v1907_v13  ;;  %v1889_v21 = vsub.f32 1.0, %v1888_v22 }
 0x3a4   : > { %v1940_v10 = vadd.f32 %v1922_v8, %v3788_v17  ;;  %v1938_v0 = vadd.f32 %v1936_v23, %v1922_v8 }
 0x3a5   : > { %v1890_v29 = vmul.f32 %v2744_v20, %v1889_v21 }
 0x3a6   : > { %1944 = vst [vmem:[%s3864_s3] sm:$0xff] %v1940_v10 }
 0x3a7   : > { %1942 = vst [vmem:[%s3868_s17] sm:$0xff] %v1938_v0  ;;  %v1891_v60 = vadd.f32 %v2744_v20, %v1890_v29 }
 0x3a9   : > { %v2746_v17 = vpop.eup %2745  ;;  %v1895_v34 = vsel %vm1894_vm14, %v2744_v20, %v1891_v60 }
 0x3aa   : > { %v1900_v49 = vsel %vm1897_vm15, %v1899_v33, %v1895_v34 }
 0x3ab   : > { %v1911_v43 = vmul.f32 %v2746_v17, %v1900_v49 }
 0x3ad   : > { %v1923_v3 = vmul.f32 %v1920_v51, %v1911_v43 }
 0x3af   : > { %v1941_v4 = vadd.f32 %v1923_v3, %v3800_v7  ;;  %v1939_v40 = vadd.f32 %v1937_v2, %v1923_v3 }
 0x3b1   : > { %1945 = vst [vmem:[%s3864_s3 + $0x8] sm:$0xff] %v1941_v4 }
 0x3b2   : > { %2864 = shalt.err (!%p2861_p0)
}
 0x3b3   : > { %s2944_s3 = smov 128   ;;  %s2945_s10 = smov 8   ;;  %1943 = vst [vmem:[%s3868_s17 + $0x8] sm:$0xff] %v1939_v40 }
 0x3b4   : > { %2556 = dma.vmem_to_hbm [thread:$0]  (%p3027_p11), %s1965_s25, 256, %s1967_s19, %s1947_s18, %s2944_s3, %s2944_s3, %s2945_s10  }
 0x3b5   : > { %s1952_s12 = scalar_lea.sflag [#allocation11], %s3115_s21  ;;  %s2879_s28 = sshra.s32 %s3884_s23, 4  ;;  %s2880_s28 = int_to_ptr.hbm [resolvable:$true] %s2879_s28 }
 0x3b6   : > { %s2881_s9 = scalar_lea.hbm %s2880_s28, 16  ;;  %s2885_s30 = scalar_lea.hbm %s3936_s6, 32 }
 0x3b7   : > { %p2882_p8 = scmp.ne.s32.totalorder %s2880_s28, %s2881_s9  ;;  %p2886_p6 = scmp.lt.s32.totalorder %s2880_s28, %s3936_s6 }
 0x3b8   : > { %p2887_p13 = scmp.lt.s32.totalorder %s2885_s30, %s2881_s9 }
 0x3b9   : > { %p2883_p10 = pnand %p2882_p8, %p3027_p11 }
 0x3ba   : > { %p2888_p2 = por %p2887_p13, %p2886_p6 }
 0x3bb   : > { %p2884_p1 = pneg %p2883_p10 }
 0x3bd   : > { %p2889_p3 = pnand %p2888_p2, %p2884_p1 }
 0x3bf   : > { %2892 = shalt.err (!%p2889_p3)
}
 0x3c0   : > { %2557 = dma.vmem_to_hbm [thread:$0]  (%p3027_p11), %s3882_s14, 256, %s3884_s23, %s1952_s12, %s2944_s3, %s2944_s3, %s2945_s10  }
 0x3c1 PF: > { %s4037_s21 = sld [smem:[#allocation16_spill]]  ;;  %p2571_p4 = pnand %p2150_p9, %p3031_p12 }
 0x3c3   : > { %p2572_p5 = pneg %p2571_p4 }
 0x3c7   : > { %s1998_s25 = sand.u32 1, %s4037_s21  }
 0x3c8   : > { %s1999_s19 = scalar_lea.sflag [#allocation5], %s1998_s25 }
 0x3c9   : > { %2918 = dma.done.wait (%p2572_p5), %s1999_s19, 256  }
 0x3ca   : > { %2920 = vsyncadd (%p2572_p5), %s1999_s19, 4294967040  ;;  %s2009_s18 = scalar_lea.sflag [#allocation11], %s1998_s25 }
 0x3cb   : > { %2922 = dma.done.wait (%p2572_p5), %s2009_s18, 256  }
 0x3cc   : > { %2924 = vsyncadd (%p2572_p5), %s2009_s18, 4294967040  ;;  %s4039_s24 = sld [smem:[#allocation18_spill]]  ;;  %s4042_s21 = smov %s2931_s22 }
 0x3cd   : > { %s4040_s11 = sld [smem:[#allocation17_spill]] }
 0x3ce   : > { %s4041_s23 = sld [smem:[#allocation19_spill]] }
 0x3d2   : > { %p26_p11 = scmp.ge.s32.totalorder %s4039_s24, 4  }
 0x3d3   : > { %s4043_s22 = smov %s4040_s11 }
 0x3d4   :  { %28 = sbr.rel (!%p26_p11) target bundleno = 11 (0xb), region = 136 }
 0x3d9   :  { %2015 = vsyncpa [#allocation4], 1 }
 0x3da   :  { %2017 = vsyncpa [#allocation4 + $0x1], 1 }
 0x3db   :  { %2018 = vsyncpa [#allocation7], 1 }
 0x3dc   :  { %2020 = vsyncpa [#allocation7 + $0x1], 1 }
 0x3dd   :  { %2021 = vsyncpa [#allocation5], 1 }
 0x3de   :  { %2023 = vsyncpa [#allocation5 + $0x1], 1 }
 0x3df   :  { %2024 = vsyncpa [#allocation11], 1 }
 0x3e0   :  { %2026 = vsyncpa [#allocation11 + $0x1], 1 }

</bundles_post_ra>
